<compile_context>
chip_gen: v6e
topology: v6e:2x2x1
jax: 0.10.0
libtpu: 0.0.40
codegen_flags: <defaults>
</compile_context>

<pallas_src>
import functools

import jax
import jax.numpy as jnp
from jax import lax
from jax.experimental import pallas as pl
from jax.experimental.pallas import tpu as pltpu


def cbow_loss_kernel(ctx_ref,            # SMEM (B, C) int32   (scalar prefetch)
                     tgt_ref,            # VMEM (B_blk, 1) int32
                     in_w_ref,           # VMEM (V, E) f32     (full in_embed table)
                     out_w_ref,          # VMEM (V_blk, E) f32 (out_embed vocab tile)
                     out_ref,            # VMEM (B_blk, 1) f32 per-example loss
                     hidden,             # VMEM (B_blk, E) f32 scratch
                     m_sc, l_sc, t_sc,   # VMEM (B_blk, 1) f32 scratch
                     *, padding_id):
    b_idx = pl.program_id(0)
    v_idx = pl.program_id(1)
    n_v = pl.num_programs(1)

    B_blk, E = hidden.shape
    V_blk = out_w_ref.shape[0]
    C = ctx_ref.shape[1]

    # ---- once per batch block (v == 0): embedding gather + context sum,
    #      and init the online-softmax / target-logit accumulators.
    @pl.when(v_idx == 0)
    def _init():
        m_sc[...] = jnp.full_like(m_sc, -jnp.inf)
        l_sc[...] = jnp.zeros_like(l_sc)
        t_sc[...] = jnp.zeros_like(t_sc)
        for b in range(B_blk):                      # static unroll, B_blk is small
            gb = b_idx * B_blk + b

            def ctx_body(c, acc):
                tok = ctx_ref[gb, c]                # scalar read from SMEM
                keep = (tok != padding_id).astype(jnp.float32)  # padding row -> 0
                return acc + keep * in_w_ref[pl.ds(tok, 1), :]  # (1, E) row gather

            row = lax.fori_loop(0, C, ctx_body,
                                jnp.zeros((1, E), jnp.float32), unroll=True)
            hidden[b:b + 1, :] = row

    # ---- per vocab tile: logits, online logsumexp, target-logit pick.
    # dot_general contracting over E of both operands == hidden @ out_w.T
    logits = lax.dot_general(hidden[...], out_w_ref[...],
                             dimension_numbers=(((1,), (1,)), ((), ())),
                             preferred_element_type=jnp.float32)  # (B_blk, V_blk)

    m_prev = m_sc[...]
    m_new = jnp.maximum(m_prev, jnp.max(logits, axis=-1, keepdims=True))
    alpha = jnp.exp(m_prev - m_new)                 # == 0 on the first tile
    l_sc[...] = alpha * l_sc[...] + jnp.sum(jnp.exp(logits - m_new),
                                            axis=-1, keepdims=True)
    m_sc[...] = m_new

    col = v_idx * V_blk + lax.broadcasted_iota(jnp.int32, (B_blk, V_blk), 1)
    hit = col == tgt_ref[...]                       # (B_blk, V_blk), lane broadcast
    t_sc[...] += jnp.sum(jnp.where(hit, logits, 0.0), axis=-1, keepdims=True)

    # ---- finalize: per-example CE loss = logsumexp(logits) - logits[target]
    @pl.when(v_idx == n_v - 1)
    def _finalize():
        out_ref[...] = (m_sc[...] + jnp.log(l_sc[...])) - t_sc[...]


def cbow_loss(contexts, targets, in_weight, out_weight, padding_id,
              *, block_b=None, block_v=128):
    """contexts: (B, C) int, targets: (B,) int, weights: (V, E) f32."""
    B, C = contexts.shape
    V, E = in_weight.shape
    if block_b is None:
        block_b = min(B, 128)
    assert B % block_b == 0 and V % block_v == 0, "demo assumes divisible tiles"
    n_b = B // block_b
    n_v = V // block_v

    contexts = contexts.astype(jnp.int32)
    targets2d = targets.astype(jnp.int32).reshape(B, 1)

    kernel = functools.partial(cbow_loss_kernel, padding_id=int(padding_id))

    # TODO(synk): for vocab sizes where the (V, E) in_embed table no longer fits
    # VMEM, replace the resident-table row gather with a manual HBM DMA gather
    # (memory_space=pl.ANY + make_async_copy per context row).
    grid_spec = pltpu.PrefetchScalarGridSpec(
        num_scalar_prefetch=1,                      # contexts -> SMEM
        grid=(n_b, n_v),                            # reduction (vocab) axis last
        in_specs=[
            pl.BlockSpec((block_b, 1), lambda b, v, ctx: (b, 0)),   # targets
            pl.BlockSpec((V, E), lambda b, v, ctx: (0, 0)),         # in_embed (full)
            pl.BlockSpec((block_v, E), lambda b, v, ctx: (v, 0)),   # out_embed tile
        ],
        out_specs=pl.BlockSpec((block_b, 1), lambda b, v, ctx: (b, 0)),
        scratch_shapes=[
            pltpu.VMEM((block_b, E), jnp.float32),  # hidden state (context sum)
            pltpu.VMEM((block_b, 1), jnp.float32),  # running max
            pltpu.VMEM((block_b, 1), jnp.float32),  # running sum-exp
            pltpu.VMEM((block_b, 1), jnp.float32),  # target logit
        ],
    )

    per_example = pl.pallas_call(
        kernel,
        grid_spec=grid_spec,
        out_shape=jax.ShapeDtypeStruct((B, 1), jnp.float32),
        compiler_params=pltpu.CompilerParams(
            dimension_semantics=("parallel", "arbitrary"),
            vmem_limit_bytes=4 << 20,               # kernel needs well under 1 MiB
        ),
    )(contexts, targets2d, in_weight, out_weight)

    # CrossEntropyLoss(reduction='mean'): tiny (B,) reduce done in the wrapper.
    return jnp.mean(per_example)


def reference_loss(contexts, targets, in_weight, out_weight, padding_id):
    in_w = in_weight.at[padding_id].set(0.0)        # padding_idx contributes zero
    emb = jnp.take(in_w, contexts, axis=0)          # (B, C, E)
    hidden = jnp.sum(emb, axis=1)                   # (B, E)
    logits = hidden @ out_weight.T                  # (B, V)
    logz = jax.scipy.special.logsumexp(logits, axis=-1)
    tgt = jnp.take_along_axis(logits, targets[:, None], axis=-1)[:, 0]
    return jnp.mean(logz - tgt)


if __name__ == "__main__":
    vocab_size = 256
    embed_size = 128
    B, C = 8, 4
    padding_id = 0

    key = jax.random.PRNGKey(0)
    k1, k2, k3, k4 = jax.random.split(key, 4)
    # Deterministic synthetic parameters (Embedding ~ N(0,1), Linear ~ small normal).
    in_weight = jax.random.normal(k1, (vocab_size, embed_size), dtype=jnp.float32)
    out_weight = 0.05 * jax.random.normal(k2, (vocab_size, embed_size), dtype=jnp.float32)

    contexts = jax.random.randint(k3, (B, C), 0, vocab_size, dtype=jnp.int32)
    targets = jax.random.randint(k4, (B,), 0, vocab_size, dtype=jnp.int32)

    loss = cbow_loss(contexts, targets, in_weight, out_weight, padding_id)
    jax.block_until_ready(loss)

    ref = reference_loss(contexts, targets, in_weight, out_weight, padding_id)
    assert jnp.allclose(loss, ref, rtol=1e-5, atol=1e-5), (loss, ref)

    print("KERNEL_OK")
</pallas_src>

<mosaic_0001>
module attributes {stable_mosaic.version = 11 : i64} {
  func.func @cbow_loss_kernel(%arg0: i32, %arg1: i32, %arg2: memref<8x4xi32, #tpu.memory_space<smem>>, %arg3: memref<8x1xi32, #tpu.memory_space<vmem>>, %arg4: memref<256x128xf32, #tpu.memory_space<vmem>>, %arg5: memref<128x128xf32, #tpu.memory_space<vmem>>, %arg6: memref<8x1xf32, #tpu.memory_space<vmem>>, %arg7: memref<8x128xf32, #tpu.memory_space<vmem>>, %arg8: memref<8x1xf32, #tpu.memory_space<vmem>>, %arg9: memref<8x1xf32, #tpu.memory_space<vmem>>, %arg10: memref<8x1xf32, #tpu.memory_space<vmem>>) attributes {dimension_semantics = [#tpu.dimension_semantics<parallel>, #tpu.dimension_semantics<arbitrary>], iteration_bounds = array<i64: 1, 2>, scalar_prefetch = 1 : i64, scratch_operands = 4 : i64, tpu.core_type = #tpu.core_type<tc>, window_params = [{transform_indices = @transform_0, window_bounds = array<i64: 8, 1>}, {pipeline_mode = #tpu.pipeline_mode<synchronous>, transform_indices = @transform_1, window_bounds = array<i64: 256, 128>}, {transform_indices = @transform_2, window_bounds = array<i64: 128, 128>}, {transform_indices = @transform_3, window_bounds = array<i64: 8, 1>}]} {
    %c0_i32 = arith.constant 0 : i32
    %0 = arith.cmpi eq, %arg1, %c0_i32 : i32
    %1 = arith.extui %0 : i1 to i32
    %c0_i32_0 = arith.constant 0 : i32
    %2 = arith.cmpi ne, %1, %c0_i32_0 : i32
    scf.if %2 {
      %cst_23 = arith.constant 0xFF800000 : f32
      %39 = vector.broadcast %cst_23 : f32 to vector<8x1xf32>
      %c0_24 = arith.constant 0 : index
      %c0_25 = arith.constant 0 : index
      %40 = vector.load %arg8[%c0_24, %c0_25] : memref<8x1xf32, #tpu.memory_space<vmem>>, vector<8x1xf32>
      tpu.vector_store %arg8[%c0_24, %c0_25], %39 {strides = array<i32>} : memref<8x1xf32, #tpu.memory_space<vmem>>, vector<8x1xf32>,
      %cst_26 = arith.constant 0.000000e+00 : f32
      %41 = vector.broadcast %cst_26 : f32 to vector<8x1xf32>
      %c0_27 = arith.constant 0 : index
      %c0_28 = arith.constant 0 : index
      %42 = vector.load %arg9[%c0_27, %c0_28] : memref<8x1xf32, #tpu.memory_space<vmem>>, vector<8x1xf32>
      tpu.vector_store %arg9[%c0_27, %c0_28], %41 {strides = array<i32>} : memref<8x1xf32, #tpu.memory_space<vmem>>, vector<8x1xf32>,
      %cst_29 = arith.constant 0.000000e+00 : f32
      %43 = vector.broadcast %cst_29 : f32 to vector<8x1xf32>
      %c0_30 = arith.constant 0 : index
      %c0_31 = arith.constant 0 : index
      %44 = vector.load %arg10[%c0_30, %c0_31] : memref<8x1xf32, #tpu.memory_space<vmem>>, vector<8x1xf32>
      tpu.vector_store %arg10[%c0_30, %c0_31], %43 {strides = array<i32>} : memref<8x1xf32, #tpu.memory_space<vmem>>, vector<8x1xf32>,
      %c8_i32 = arith.constant 8 : i32
      %45 = arith.muli %arg0, %c8_i32 : i32
      %c0_i32_32 = arith.constant 0 : i32
      %46 = arith.addi %45, %c0_i32_32 : i32
      %cst_33 = arith.constant 0.000000e+00 : f32
      %47 = vector.broadcast %cst_33 : f32 to vector<1x128xf32>
      %c0_i32_34 = arith.constant 0 : i32
      %48 = arith.index_cast %46 : i32 to index
      %49 = arith.index_cast %c0_i32_34 : i32 to index
      %50 = memref.load %arg2[%48, %49] : memref<8x4xi32, #tpu.memory_space<smem>>
      %c0_i32_35 = arith.constant 0 : i32
      %51 = arith.cmpi ne, %50, %c0_i32_35 : i32
      %52 = arith.extui %51 : i1 to i32
      %53 = arith.sitofp %52 : i32 to f32
      %54 = arith.index_cast %50 : i32 to index
      %c0_36 = arith.constant 0 : index
      %55 = vector.load %arg4[%54, %c0_36] : memref<256x128xf32, #tpu.memory_space<vmem>>, vector<1x128xf32>
      %56 = vector.broadcast %53 : f32 to vector<1x128xf32>
      %57 = arith.mulf %56, %55 : vector<1x128xf32>
      %58 = arith.addf %47, %57 : vector<1x128xf32>
      %c1_i32_37 = arith.constant 1 : i32
      %59 = arith.index_cast %46 : i32 to index
      %60 = arith.index_cast %c1_i32_37 : i32 to index
      %61 = memref.load %arg2[%59, %60] : memref<8x4xi32, #tpu.memory_space<smem>>
      %c0_i32_38 = arith.constant 0 : i32
      %62 = arith.cmpi ne, %61, %c0_i32_38 : i32
      %63 = arith.extui %62 : i1 to i32
      %64 = arith.sitofp %63 : i32 to f32
      %65 = arith.index_cast %61 : i32 to index
      %c0_39 = arith.constant 0 : index
      %66 = vector.load %arg4[%65, %c0_39] : memref<256x128xf32, #tpu.memory_space<vmem>>, vector<1x128xf32>
      %67 = vector.broadcast %64 : f32 to vector<1x128xf32>
      %68 = arith.mulf %67, %66 : vector<1x128xf32>
      %69 = arith.addf %58, %68 : vector<1x128xf32>
      %c2_i32 = arith.constant 2 : i32
      %70 = arith.index_cast %46 : i32 to index
      %71 = arith.index_cast %c2_i32 : i32 to index
      %72 = memref.load %arg2[%70, %71] : memref<8x4xi32, #tpu.memory_space<smem>>
      %c0_i32_40 = arith.constant 0 : i32
      %73 = arith.cmpi ne, %72, %c0_i32_40 : i32
      %74 = arith.extui %73 : i1 to i32
      %75 = arith.sitofp %74 : i32 to f32
      %76 = arith.index_cast %72 : i32 to index
      %c0_41 = arith.constant 0 : index
      %77 = vector.load %arg4[%76, %c0_41] : memref<256x128xf32, #tpu.memory_space<vmem>>, vector<1x128xf32>
      %78 = vector.broadcast %75 : f32 to vector<1x128xf32>
      %79 = arith.mulf %78, %77 : vector<1x128xf32>
      %80 = arith.addf %69, %79 : vector<1x128xf32>
      %c3_i32 = arith.constant 3 : i32
      %81 = arith.index_cast %46 : i32 to index
      %82 = arith.index_cast %c3_i32 : i32 to index
      %83 = memref.load %arg2[%81, %82] : memref<8x4xi32, #tpu.memory_space<smem>>
      %c0_i32_42 = arith.constant 0 : i32
      %84 = arith.cmpi ne, %83, %c0_i32_42 : i32
      %85 = arith.extui %84 : i1 to i32
      %86 = arith.sitofp %85 : i32 to f32
      %87 = arith.index_cast %83 : i32 to index
      %c0_43 = arith.constant 0 : index
      %88 = vector.load %arg4[%87, %c0_43] : memref<256x128xf32, #tpu.memory_space<vmem>>, vector<1x128xf32>
      %89 = vector.broadcast %86 : f32 to vector<1x128xf32>
      %90 = arith.mulf %89, %88 : vector<1x128xf32>
      %91 = arith.addf %80, %90 : vector<1x128xf32>
      %c4_i32 = arith.constant 4 : i32
      %c0_44 = arith.constant 0 : index
      %c0_45 = arith.constant 0 : index
      %92 = vector.load %arg7[%c0_44, %c0_45] : memref<8x128xf32, #tpu.memory_space<vmem>>, vector<1x128xf32>
      tpu.vector_store %arg7[%c0_44, %c0_45], %91 {strides = array<i32>} : memref<8x128xf32, #tpu.memory_space<vmem>>, vector<1x128xf32>,
      %c8_i32_46 = arith.constant 8 : i32
      %93 = arith.muli %arg0, %c8_i32_46 : i32
      %c1_i32_47 = arith.constant 1 : i32
      %94 = arith.addi %93, %c1_i32_47 : i32
      %cst_48 = arith.constant 0.000000e+00 : f32
      %95 = vector.broadcast %cst_48 : f32 to vector<1x128xf32>
      %c0_i32_49 = arith.constant 0 : i32
      %96 = arith.index_cast %94 : i32 to index
      %97 = arith.index_cast %c0_i32_49 : i32 to index
      %98 = memref.load %arg2[%96, %97] : memref<8x4xi32, #tpu.memory_space<smem>>
      %c0_i32_50 = arith.constant 0 : i32
      %99 = arith.cmpi ne, %98, %c0_i32_50 : i32
      %100 = arith.extui %99 : i1 to i32
      %101 = arith.sitofp %100 : i32 to f32
      %102 = arith.index_cast %98 : i32 to index
      %c0_51 = arith.constant 0 : index
      %103 = vector.load %arg4[%102, %c0_51] : memref<256x128xf32, #tpu.memory_space<vmem>>, vector<1x128xf32>
      %104 = vector.broadcast %101 : f32 to vector<1x128xf32>
      %105 = arith.mulf %104, %103 : vector<1x128xf32>
      %106 = arith.addf %95, %105 : vector<1x128xf32>
      %c1_i32_52 = arith.constant 1 : i32
      %107 = arith.index_cast %94 : i32 to index
      %108 = arith.index_cast %c1_i32_52 : i32 to index
      %109 = memref.load %arg2[%107, %108] : memref<8x4xi32, #tpu.memory_space<smem>>
      %c0_i32_53 = arith.constant 0 : i32
      %110 = arith.cmpi ne, %109, %c0_i32_53 : i32
      %111 = arith.extui %110 : i1 to i32
      %112 = arith.sitofp %111 : i32 to f32
      %113 = arith.index_cast %109 : i32 to index
      %c0_54 = arith.constant 0 : index
      %114 = vector.load %arg4[%113, %c0_54] : memref<256x128xf32, #tpu.memory_space<vmem>>, vector<1x128xf32>
      %115 = vector.broadcast %112 : f32 to vector<1x128xf32>
      %116 = arith.mulf %115, %114 : vector<1x128xf32>
      %117 = arith.addf %106, %116 : vector<1x128xf32>
      %c2_i32_55 = arith.constant 2 : i32
      %118 = arith.index_cast %94 : i32 to index
      %119 = arith.index_cast %c2_i32_55 : i32 to index
      %120 = memref.load %arg2[%118, %119] : memref<8x4xi32, #tpu.memory_space<smem>>
      %c0_i32_56 = arith.constant 0 : i32
      %121 = arith.cmpi ne, %120, %c0_i32_56 : i32
      %122 = arith.extui %121 : i1 to i32
      %123 = arith.sitofp %122 : i32 to f32
      %124 = arith.index_cast %120 : i32 to index
      %c0_57 = arith.constant 0 : index
      %125 = vector.load %arg4[%124, %c0_57] : memref<256x128xf32, #tpu.memory_space<vmem>>, vector<1x128xf32>
      %126 = vector.broadcast %123 : f32 to vector<1x128xf32>
      %127 = arith.mulf %126, %125 : vector<1x128xf32>
      %128 = arith.addf %117, %127 : vector<1x128xf32>
      %c3_i32_58 = arith.constant 3 : i32
      %129 = arith.index_cast %94 : i32 to index
      %130 = arith.index_cast %c3_i32_58 : i32 to index
      %131 = memref.load %arg2[%129, %130] : memref<8x4xi32, #tpu.memory_space<smem>>
      %c0_i32_59 = arith.constant 0 : i32
      %132 = arith.cmpi ne, %131, %c0_i32_59 : i32
      %133 = arith.extui %132 : i1 to i32
      %134 = arith.sitofp %133 : i32 to f32
      %135 = arith.index_cast %131 : i32 to index
      %c0_60 = arith.constant 0 : index
      %136 = vector.load %arg4[%135, %c0_60] : memref<256x128xf32, #tpu.memory_space<vmem>>, vector<1x128xf32>
      %137 = vector.broadcast %134 : f32 to vector<1x128xf32>
      %138 = arith.mulf %137, %136 : vector<1x128xf32>
      %139 = arith.addf %128, %138 : vector<1x128xf32>
      %c4_i32_61 = arith.constant 4 : i32
      %c1 = arith.constant 1 : index
      %c0_62 = arith.constant 0 : index
      %140 = vector.load %arg7[%c1, %c0_62] : memref<8x128xf32, #tpu.memory_space<vmem>>, vector<1x128xf32>
      tpu.vector_store %arg7[%c1, %c0_62], %139 {strides = array<i32>} : memref<8x128xf32, #tpu.memory_space<vmem>>, vector<1x128xf32>,
      %c8_i32_63 = arith.constant 8 : i32
      %141 = arith.muli %arg0, %c8_i32_63 : i32
      %c2_i32_64 = arith.constant 2 : i32
      %142 = arith.addi %141, %c2_i32_64 : i32
      %cst_65 = arith.constant 0.000000e+00 : f32
      %143 = vector.broadcast %cst_65 : f32 to vector<1x128xf32>
      %c0_i32_66 = arith.constant 0 : i32
      %144 = arith.index_cast %142 : i32 to index
      %145 = arith.index_cast %c0_i32_66 : i32 to index
      %146 = memref.load %arg2[%144, %145] : memref<8x4xi32, #tpu.memory_space<smem>>
      %c0_i32_67 = arith.constant 0 : i32
      %147 = arith.cmpi ne, %146, %c0_i32_67 : i32
      %148 = arith.extui %147 : i1 to i32
      %149 = arith.sitofp %148 : i32 to f32
      %150 = arith.index_cast %146 : i32 to index
      %c0_68 = arith.constant 0 : index
      %151 = vector.load %arg4[%150, %c0_68] : memref<256x128xf32, #tpu.memory_space<vmem>>, vector<1x128xf32>
      %152 = vector.broadcast %149 : f32 to vector<1x128xf32>
      %153 = arith.mulf %152, %151 : vector<1x128xf32>
      %154 = arith.addf %143, %153 : vector<1x128xf32>
      %c1_i32_69 = arith.constant 1 : i32
      %155 = arith.index_cast %142 : i32 to index
      %156 = arith.index_cast %c1_i32_69 : i32 to index
      %157 = memref.load %arg2[%155, %156] : memref<8x4xi32, #tpu.memory_space<smem>>
      %c0_i32_70 = arith.constant 0 : i32
      %158 = arith.cmpi ne, %157, %c0_i32_70 : i32
      %159 = arith.extui %158 : i1 to i32
      %160 = arith.sitofp %159 : i32 to f32
      %161 = arith.index_cast %157 : i32 to index
      %c0_71 = arith.constant 0 : index
      %162 = vector.load %arg4[%161, %c0_71] : memref<256x128xf32, #tpu.memory_space<vmem>>, vector<1x128xf32>
      %163 = vector.broadcast %160 : f32 to vector<1x128xf32>
      %164 = arith.mulf %163, %162 : vector<1x128xf32>
      %165 = arith.addf %154, %164 : vector<1x128xf32>
      %c2_i32_72 = arith.constant 2 : i32
      %166 = arith.index_cast %142 : i32 to index
      %167 = arith.index_cast %c2_i32_72 : i32 to index
      %168 = memref.load %arg2[%166, %167] : memref<8x4xi32, #tpu.memory_space<smem>>
      %c0_i32_73 = arith.constant 0 : i32
      %169 = arith.cmpi ne, %168, %c0_i32_73 : i32
      %170 = arith.extui %169 : i1 to i32
      %171 = arith.sitofp %170 : i32 to f32
      %172 = arith.index_cast %168 : i32 to index
      %c0_74 = arith.constant 0 : index
      %173 = vector.load %arg4[%172, %c0_74] : memref<256x128xf32, #tpu.memory_space<vmem>>, vector<1x128xf32>
      %174 = vector.broadcast %171 : f32 to vector<1x128xf32>
      %175 = arith.mulf %174, %173 : vector<1x128xf32>
      %176 = arith.addf %165, %175 : vector<1x128xf32>
      %c3_i32_75 = arith.constant 3 : i32
      %177 = arith.index_cast %142 : i32 to index
      %178 = arith.index_cast %c3_i32_75 : i32 to index
      %179 = memref.load %arg2[%177, %178] : memref<8x4xi32, #tpu.memory_space<smem>>
      %c0_i32_76 = arith.constant 0 : i32
      %180 = arith.cmpi ne, %179, %c0_i32_76 : i32
      %181 = arith.extui %180 : i1 to i32
      %182 = arith.sitofp %181 : i32 to f32
      %183 = arith.index_cast %179 : i32 to index
      %c0_77 = arith.constant 0 : index
      %184 = vector.load %arg4[%183, %c0_77] : memref<256x128xf32, #tpu.memory_space<vmem>>, vector<1x128xf32>
      %185 = vector.broadcast %182 : f32 to vector<1x128xf32>
      %186 = arith.mulf %185, %184 : vector<1x128xf32>
      %187 = arith.addf %176, %186 : vector<1x128xf32>
      %c4_i32_78 = arith.constant 4 : i32
      %c2 = arith.constant 2 : index
      %c0_79 = arith.constant 0 : index
      %188 = vector.load %arg7[%c2, %c0_79] : memref<8x128xf32, #tpu.memory_space<vmem>>, vector<1x128xf32>
      tpu.vector_store %arg7[%c2, %c0_79], %187 {strides = array<i32>} : memref<8x128xf32, #tpu.memory_space<vmem>>, vector<1x128xf32>,
      %c8_i32_80 = arith.constant 8 : i32
      %189 = arith.muli %arg0, %c8_i32_80 : i32
      %c3_i32_81 = arith.constant 3 : i32
      %190 = arith.addi %189, %c3_i32_81 : i32
      %cst_82 = arith.constant 0.000000e+00 : f32
      %191 = vector.broadcast %cst_82 : f32 to vector<1x128xf32>
      %c0_i32_83 = arith.constant 0 : i32
      %192 = arith.index_cast %190 : i32 to index
      %193 = arith.index_cast %c0_i32_83 : i32 to index
      %194 = memref.load %arg2[%192, %193] : memref<8x4xi32, #tpu.memory_space<smem>>
      %c0_i32_84 = arith.constant 0 : i32
      %195 = arith.cmpi ne, %194, %c0_i32_84 : i32
      %196 = arith.extui %195 : i1 to i32
      %197 = arith.sitofp %196 : i32 to f32
      %198 = arith.index_cast %194 : i32 to index
      %c0_85 = arith.constant 0 : index
      %199 = vector.load %arg4[%198, %c0_85] : memref<256x128xf32, #tpu.memory_space<vmem>>, vector<1x128xf32>
      %200 = vector.broadcast %197 : f32 to vector<1x128xf32>
      %201 = arith.mulf %200, %199 : vector<1x128xf32>
      %202 = arith.addf %191, %201 : vector<1x128xf32>
      %c1_i32_86 = arith.constant 1 : i32
      %203 = arith.index_cast %190 : i32 to index
      %204 = arith.index_cast %c1_i32_86 : i32 to index
      %205 = memref.load %arg2[%203, %204] : memref<8x4xi32, #tpu.memory_space<smem>>
      %c0_i32_87 = arith.constant 0 : i32
      %206 = arith.cmpi ne, %205, %c0_i32_87 : i32
      %207 = arith.extui %206 : i1 to i32
      %208 = arith.sitofp %207 : i32 to f32
      %209 = arith.index_cast %205 : i32 to index
      %c0_88 = arith.constant 0 : index
      %210 = vector.load %arg4[%209, %c0_88] : memref<256x128xf32, #tpu.memory_space<vmem>>, vector<1x128xf32>
      %211 = vector.broadcast %208 : f32 to vector<1x128xf32>
      %212 = arith.mulf %211, %210 : vector<1x128xf32>
      %213 = arith.addf %202, %212 : vector<1x128xf32>
      %c2_i32_89 = arith.constant 2 : i32
      %214 = arith.index_cast %190 : i32 to index
      %215 = arith.index_cast %c2_i32_89 : i32 to index
      %216 = memref.load %arg2[%214, %215] : memref<8x4xi32, #tpu.memory_space<smem>>
      %c0_i32_90 = arith.constant 0 : i32
      %217 = arith.cmpi ne, %216, %c0_i32_90 : i32
      %218 = arith.extui %217 : i1 to i32
      %219 = arith.sitofp %218 : i32 to f32
      %220 = arith.index_cast %216 : i32 to index
      %c0_91 = arith.constant 0 : index
      %221 = vector.load %arg4[%220, %c0_91] : memref<256x128xf32, #tpu.memory_space<vmem>>, vector<1x128xf32>
      %222 = vector.broadcast %219 : f32 to vector<1x128xf32>
      %223 = arith.mulf %222, %221 : vector<1x128xf32>
      %224 = arith.addf %213, %223 : vector<1x128xf32>
      %c3_i32_92 = arith.constant 3 : i32
      %225 = arith.index_cast %190 : i32 to index
      %226 = arith.index_cast %c3_i32_92 : i32 to index
      %227 = memref.load %arg2[%225, %226] : memref<8x4xi32, #tpu.memory_space<smem>>
      %c0_i32_93 = arith.constant 0 : i32
      %228 = arith.cmpi ne, %227, %c0_i32_93 : i32
      %229 = arith.extui %228 : i1 to i32
      %230 = arith.sitofp %229 : i32 to f32
      %231 = arith.index_cast %227 : i32 to index
      %c0_94 = arith.constant 0 : index
      %232 = vector.load %arg4[%231, %c0_94] : memref<256x128xf32, #tpu.memory_space<vmem>>, vector<1x128xf32>
      %233 = vector.broadcast %230 : f32 to vector<1x128xf32>
      %234 = arith.mulf %233, %232 : vector<1x128xf32>
      %235 = arith.addf %224, %234 : vector<1x128xf32>
      %c4_i32_95 = arith.constant 4 : i32
      %c3 = arith.constant 3 : index
      %c0_96 = arith.constant 0 : index
      %236 = vector.load %arg7[%c3, %c0_96] : memref<8x128xf32, #tpu.memory_space<vmem>>, vector<1x128xf32>
      tpu.vector_store %arg7[%c3, %c0_96], %235 {strides = array<i32>} : memref<8x128xf32, #tpu.memory_space<vmem>>, vector<1x128xf32>,
      %c8_i32_97 = arith.constant 8 : i32
      %237 = arith.muli %arg0, %c8_i32_97 : i32
      %c4_i32_98 = arith.constant 4 : i32
      %238 = arith.addi %237, %c4_i32_98 : i32
      %cst_99 = arith.constant 0.000000e+00 : f32
      %239 = vector.broadcast %cst_99 : f32 to vector<1x128xf32>
      %c0_i32_100 = arith.constant 0 : i32
      %240 = arith.index_cast %238 : i32 to index
      %241 = arith.index_cast %c0_i32_100 : i32 to index
      %242 = memref.load %arg2[%240, %241] : memref<8x4xi32, #tpu.memory_space<smem>>
      %c0_i32_101 = arith.constant 0 : i32
      %243 = arith.cmpi ne, %242, %c0_i32_101 : i32
      %244 = arith.extui %243 : i1 to i32
      %245 = arith.sitofp %244 : i32 to f32
      %246 = arith.index_cast %242 : i32 to index
      %c0_102 = arith.constant 0 : index
      %247 = vector.load %arg4[%246, %c0_102] : memref<256x128xf32, #tpu.memory_space<vmem>>, vector<1x128xf32>
      %248 = vector.broadcast %245 : f32 to vector<1x128xf32>
      %249 = arith.mulf %248, %247 : vector<1x128xf32>
      %250 = arith.addf %239, %249 : vector<1x128xf32>
      %c1_i32_103 = arith.constant 1 : i32
      %251 = arith.index_cast %238 : i32 to index
      %252 = arith.index_cast %c1_i32_103 : i32 to index
      %253 = memref.load %arg2[%251, %252] : memref<8x4xi32, #tpu.memory_space<smem>>
      %c0_i32_104 = arith.constant 0 : i32
      %254 = arith.cmpi ne, %253, %c0_i32_104 : i32
      %255 = arith.extui %254 : i1 to i32
      %256 = arith.sitofp %255 : i32 to f32
      %257 = arith.index_cast %253 : i32 to index
      %c0_105 = arith.constant 0 : index
      %258 = vector.load %arg4[%257, %c0_105] : memref<256x128xf32, #tpu.memory_space<vmem>>, vector<1x128xf32>
      %259 = vector.broadcast %256 : f32 to vector<1x128xf32>
      %260 = arith.mulf %259, %258 : vector<1x128xf32>
      %261 = arith.addf %250, %260 : vector<1x128xf32>
      %c2_i32_106 = arith.constant 2 : i32
      %262 = arith.index_cast %238 : i32 to index
      %263 = arith.index_cast %c2_i32_106 : i32 to index
      %264 = memref.load %arg2[%262, %263] : memref<8x4xi32, #tpu.memory_space<smem>>
      %c0_i32_107 = arith.constant 0 : i32
      %265 = arith.cmpi ne, %264, %c0_i32_107 : i32
      %266 = arith.extui %265 : i1 to i32
      %267 = arith.sitofp %266 : i32 to f32
      %268 = arith.index_cast %264 : i32 to index
      %c0_108 = arith.constant 0 : index
      %269 = vector.load %arg4[%268, %c0_108] : memref<256x128xf32, #tpu.memory_space<vmem>>, vector<1x128xf32>
      %270 = vector.broadcast %267 : f32 to vector<1x128xf32>
      %271 = arith.mulf %270, %269 : vector<1x128xf32>
      %272 = arith.addf %261, %271 : vector<1x128xf32>
      %c3_i32_109 = arith.constant 3 : i32
      %273 = arith.index_cast %238 : i32 to index
      %274 = arith.index_cast %c3_i32_109 : i32 to index
      %275 = memref.load %arg2[%273, %274] : memref<8x4xi32, #tpu.memory_space<smem>>
      %c0_i32_110 = arith.constant 0 : i32
      %276 = arith.cmpi ne, %275, %c0_i32_110 : i32
      %277 = arith.extui %276 : i1 to i32
      %278 = arith.sitofp %277 : i32 to f32
      %279 = arith.index_cast %275 : i32 to index
      %c0_111 = arith.constant 0 : index
      %280 = vector.load %arg4[%279, %c0_111] : memref<256x128xf32, #tpu.memory_space<vmem>>, vector<1x128xf32>
      %281 = vector.broadcast %278 : f32 to vector<1x128xf32>
      %282 = arith.mulf %281, %280 : vector<1x128xf32>
      %283 = arith.addf %272, %282 : vector<1x128xf32>
      %c4_i32_112 = arith.constant 4 : i32
      %c4 = arith.constant 4 : index
      %c0_113 = arith.constant 0 : index
      %284 = vector.load %arg7[%c4, %c0_113] : memref<8x128xf32, #tpu.memory_space<vmem>>, vector<1x128xf32>
      tpu.vector_store %arg7[%c4, %c0_113], %283 {strides = array<i32>} : memref<8x128xf32, #tpu.memory_space<vmem>>, vector<1x128xf32>,
      %c8_i32_114 = arith.constant 8 : i32
      %285 = arith.muli %arg0, %c8_i32_114 : i32
      %c5_i32 = arith.constant 5 : i32
      %286 = arith.addi %285, %c5_i32 : i32
      %cst_115 = arith.constant 0.000000e+00 : f32
      %287 = vector.broadcast %cst_115 : f32 to vector<1x128xf32>
      %c0_i32_116 = arith.constant 0 : i32
      %288 = arith.index_cast %286 : i32 to index
      %289 = arith.index_cast %c0_i32_116 : i32 to index
      %290 = memref.load %arg2[%288, %289] : memref<8x4xi32, #tpu.memory_space<smem>>
      %c0_i32_117 = arith.constant 0 : i32
      %291 = arith.cmpi ne, %290, %c0_i32_117 : i32
      %292 = arith.extui %291 : i1 to i32
      %293 = arith.sitofp %292 : i32 to f32
      %294 = arith.index_cast %290 : i32 to index
      %c0_118 = arith.constant 0 : index
      %295 = vector.load %arg4[%294, %c0_118] : memref<256x128xf32, #tpu.memory_space<vmem>>, vector<1x128xf32>
      %296 = vector.broadcast %293 : f32 to vector<1x128xf32>
      %297 = arith.mulf %296, %295 : vector<1x128xf32>
      %298 = arith.addf %287, %297 : vector<1x128xf32>
      %c1_i32_119 = arith.constant 1 : i32
      %299 = arith.index_cast %286 : i32 to index
      %300 = arith.index_cast %c1_i32_119 : i32 to index
      %301 = memref.load %arg2[%299, %300] : memref<8x4xi32, #tpu.memory_space<smem>>
      %c0_i32_120 = arith.constant 0 : i32
      %302 = arith.cmpi ne, %301, %c0_i32_120 : i32
      %303 = arith.extui %302 : i1 to i32
      %304 = arith.sitofp %303 : i32 to f32
      %305 = arith.index_cast %301 : i32 to index
      %c0_121 = arith.constant 0 : index
      %306 = vector.load %arg4[%305, %c0_121] : memref<256x128xf32, #tpu.memory_space<vmem>>, vector<1x128xf32>
      %307 = vector.broadcast %304 : f32 to vector<1x128xf32>
      %308 = arith.mulf %307, %306 : vector<1x128xf32>
      %309 = arith.addf %298, %308 : vector<1x128xf32>
      %c2_i32_122 = arith.constant 2 : i32
      %310 = arith.index_cast %286 : i32 to index
      %311 = arith.index_cast %c2_i32_122 : i32 to index
      %312 = memref.load %arg2[%310, %311] : memref<8x4xi32, #tpu.memory_space<smem>>
      %c0_i32_123 = arith.constant 0 : i32
      %313 = arith.cmpi ne, %312, %c0_i32_123 : i32
      %314 = arith.extui %313 : i1 to i32
      %315 = arith.sitofp %314 : i32 to f32
      %316 = arith.index_cast %312 : i32 to index
      %c0_124 = arith.constant 0 : index
      %317 = vector.load %arg4[%316, %c0_124] : memref<256x128xf32, #tpu.memory_space<vmem>>, vector<1x128xf32>
      %318 = vector.broadcast %315 : f32 to vector<1x128xf32>
      %319 = arith.mulf %318, %317 : vector<1x128xf32>
      %320 = arith.addf %309, %319 : vector<1x128xf32>
      %c3_i32_125 = arith.constant 3 : i32
      %321 = arith.index_cast %286 : i32 to index
      %322 = arith.index_cast %c3_i32_125 : i32 to index
      %323 = memref.load %arg2[%321, %322] : memref<8x4xi32, #tpu.memory_space<smem>>
      %c0_i32_126 = arith.constant 0 : i32
      %324 = arith.cmpi ne, %323, %c0_i32_126 : i32
      %325 = arith.extui %324 : i1 to i32
      %326 = arith.sitofp %325 : i32 to f32
      %327 = arith.index_cast %323 : i32 to index
      %c0_127 = arith.constant 0 : index
      %328 = vector.load %arg4[%327, %c0_127] : memref<256x128xf32, #tpu.memory_space<vmem>>, vector<1x128xf32>
      %329 = vector.broadcast %326 : f32 to vector<1x128xf32>
      %330 = arith.mulf %329, %328 : vector<1x128xf32>
      %331 = arith.addf %320, %330 : vector<1x128xf32>
      %c4_i32_128 = arith.constant 4 : i32
      %c5 = arith.constant 5 : index
      %c0_129 = arith.constant 0 : index
      %332 = vector.load %arg7[%c5, %c0_129] : memref<8x128xf32, #tpu.memory_space<vmem>>, vector<1x128xf32>
      tpu.vector_store %arg7[%c5, %c0_129], %331 {strides = array<i32>} : memref<8x128xf32, #tpu.memory_space<vmem>>, vector<1x128xf32>,
      %c8_i32_130 = arith.constant 8 : i32
      %333 = arith.muli %arg0, %c8_i32_130 : i32
      %c6_i32 = arith.constant 6 : i32
      %334 = arith.addi %333, %c6_i32 : i32
      %cst_131 = arith.constant 0.000000e+00 : f32
      %335 = vector.broadcast %cst_131 : f32 to vector<1x128xf32>
      %c0_i32_132 = arith.constant 0 : i32
      %336 = arith.index_cast %334 : i32 to index
      %337 = arith.index_cast %c0_i32_132 : i32 to index
      %338 = memref.load %arg2[%336, %337] : memref<8x4xi32, #tpu.memory_space<smem>>
      %c0_i32_133 = arith.constant 0 : i32
      %339 = arith.cmpi ne, %338, %c0_i32_133 : i32
      %340 = arith.extui %339 : i1 to i32
      %341 = arith.sitofp %340 : i32 to f32
      %342 = arith.index_cast %338 : i32 to index
      %c0_134 = arith.constant 0 : index
      %343 = vector.load %arg4[%342, %c0_134] : memref<256x128xf32, #tpu.memory_space<vmem>>, vector<1x128xf32>
      %344 = vector.broadcast %341 : f32 to vector<1x128xf32>
      %345 = arith.mulf %344, %343 : vector<1x128xf32>
      %346 = arith.addf %335, %345 : vector<1x128xf32>
      %c1_i32_135 = arith.constant 1 : i32
      %347 = arith.index_cast %334 : i32 to index
      %348 = arith.index_cast %c1_i32_135 : i32 to index
      %349 = memref.load %arg2[%347, %348] : memref<8x4xi32, #tpu.memory_space<smem>>
      %c0_i32_136 = arith.constant 0 : i32
      %350 = arith.cmpi ne, %349, %c0_i32_136 : i32
      %351 = arith.extui %350 : i1 to i32
      %352 = arith.sitofp %351 : i32 to f32
      %353 = arith.index_cast %349 : i32 to index
      %c0_137 = arith.constant 0 : index
      %354 = vector.load %arg4[%353, %c0_137] : memref<256x128xf32, #tpu.memory_space<vmem>>, vector<1x128xf32>
      %355 = vector.broadcast %352 : f32 to vector<1x128xf32>
      %356 = arith.mulf %355, %354 : vector<1x128xf32>
      %357 = arith.addf %346, %356 : vector<1x128xf32>
      %c2_i32_138 = arith.constant 2 : i32
      %358 = arith.index_cast %334 : i32 to index
      %359 = arith.index_cast %c2_i32_138 : i32 to index
      %360 = memref.load %arg2[%358, %359] : memref<8x4xi32, #tpu.memory_space<smem>>
      %c0_i32_139 = arith.constant 0 : i32
      %361 = arith.cmpi ne, %360, %c0_i32_139 : i32
      %362 = arith.extui %361 : i1 to i32
      %363 = arith.sitofp %362 : i32 to f32
      %364 = arith.index_cast %360 : i32 to index
      %c0_140 = arith.constant 0 : index
      %365 = vector.load %arg4[%364, %c0_140] : memref<256x128xf32, #tpu.memory_space<vmem>>, vector<1x128xf32>
      %366 = vector.broadcast %363 : f32 to vector<1x128xf32>
      %367 = arith.mulf %366, %365 : vector<1x128xf32>
      %368 = arith.addf %357, %367 : vector<1x128xf32>
      %c3_i32_141 = arith.constant 3 : i32
      %369 = arith.index_cast %334 : i32 to index
      %370 = arith.index_cast %c3_i32_141 : i32 to index
      %371 = memref.load %arg2[%369, %370] : memref<8x4xi32, #tpu.memory_space<smem>>
      %c0_i32_142 = arith.constant 0 : i32
      %372 = arith.cmpi ne, %371, %c0_i32_142 : i32
      %373 = arith.extui %372 : i1 to i32
      %374 = arith.sitofp %373 : i32 to f32
      %375 = arith.index_cast %371 : i32 to index
      %c0_143 = arith.constant 0 : index
      %376 = vector.load %arg4[%375, %c0_143] : memref<256x128xf32, #tpu.memory_space<vmem>>, vector<1x128xf32>
      %377 = vector.broadcast %374 : f32 to vector<1x128xf32>
      %378 = arith.mulf %377, %376 : vector<1x128xf32>
      %379 = arith.addf %368, %378 : vector<1x128xf32>
      %c4_i32_144 = arith.constant 4 : i32
      %c6 = arith.constant 6 : index
      %c0_145 = arith.constant 0 : index
      %380 = vector.load %arg7[%c6, %c0_145] : memref<8x128xf32, #tpu.memory_space<vmem>>, vector<1x128xf32>
      tpu.vector_store %arg7[%c6, %c0_145], %379 {strides = array<i32>} : memref<8x128xf32, #tpu.memory_space<vmem>>, vector<1x128xf32>,
      %c8_i32_146 = arith.constant 8 : i32
      %381 = arith.muli %arg0, %c8_i32_146 : i32
      %c7_i32 = arith.constant 7 : i32
      %382 = arith.addi %381, %c7_i32 : i32
      %cst_147 = arith.constant 0.000000e+00 : f32
      %383 = vector.broadcast %cst_147 : f32 to vector<1x128xf32>
      %c0_i32_148 = arith.constant 0 : i32
      %384 = arith.index_cast %382 : i32 to index
      %385 = arith.index_cast %c0_i32_148 : i32 to index
      %386 = memref.load %arg2[%384, %385] : memref<8x4xi32, #tpu.memory_space<smem>>
      %c0_i32_149 = arith.constant 0 : i32
      %387 = arith.cmpi ne, %386, %c0_i32_149 : i32
      %388 = arith.extui %387 : i1 to i32
      %389 = arith.sitofp %388 : i32 to f32
      %390 = arith.index_cast %386 : i32 to index
      %c0_150 = arith.constant 0 : index
      %391 = vector.load %arg4[%390, %c0_150] : memref<256x128xf32, #tpu.memory_space<vmem>>, vector<1x128xf32>
      %392 = vector.broadcast %389 : f32 to vector<1x128xf32>
      %393 = arith.mulf %392, %391 : vector<1x128xf32>
      %394 = arith.addf %383, %393 : vector<1x128xf32>
      %c1_i32_151 = arith.constant 1 : i32
      %395 = arith.index_cast %382 : i32 to index
      %396 = arith.index_cast %c1_i32_151 : i32 to index
      %397 = memref.load %arg2[%395, %396] : memref<8x4xi32, #tpu.memory_space<smem>>
      %c0_i32_152 = arith.constant 0 : i32
      %398 = arith.cmpi ne, %397, %c0_i32_152 : i32
      %399 = arith.extui %398 : i1 to i32
      %400 = arith.sitofp %399 : i32 to f32
      %401 = arith.index_cast %397 : i32 to index
      %c0_153 = arith.constant 0 : index
      %402 = vector.load %arg4[%401, %c0_153] : memref<256x128xf32, #tpu.memory_space<vmem>>, vector<1x128xf32>
      %403 = vector.broadcast %400 : f32 to vector<1x128xf32>
      %404 = arith.mulf %403, %402 : vector<1x128xf32>
      %405 = arith.addf %394, %404 : vector<1x128xf32>
      %c2_i32_154 = arith.constant 2 : i32
      %406 = arith.index_cast %382 : i32 to index
      %407 = arith.index_cast %c2_i32_154 : i32 to index
      %408 = memref.load %arg2[%406, %407] : memref<8x4xi32, #tpu.memory_space<smem>>
      %c0_i32_155 = arith.constant 0 : i32
      %409 = arith.cmpi ne, %408, %c0_i32_155 : i32
      %410 = arith.extui %409 : i1 to i32
      %411 = arith.sitofp %410 : i32 to f32
      %412 = arith.index_cast %408 : i32 to index
      %c0_156 = arith.constant 0 : index
      %413 = vector.load %arg4[%412, %c0_156] : memref<256x128xf32, #tpu.memory_space<vmem>>, vector<1x128xf32>
      %414 = vector.broadcast %411 : f32 to vector<1x128xf32>
      %415 = arith.mulf %414, %413 : vector<1x128xf32>
      %416 = arith.addf %405, %415 : vector<1x128xf32>
      %c3_i32_157 = arith.constant 3 : i32
      %417 = arith.index_cast %382 : i32 to index
      %418 = arith.index_cast %c3_i32_157 : i32 to index
      %419 = memref.load %arg2[%417, %418] : memref<8x4xi32, #tpu.memory_space<smem>>
      %c0_i32_158 = arith.constant 0 : i32
      %420 = arith.cmpi ne, %419, %c0_i32_158 : i32
      %421 = arith.extui %420 : i1 to i32
      %422 = arith.sitofp %421 : i32 to f32
      %423 = arith.index_cast %419 : i32 to index
      %c0_159 = arith.constant 0 : index
      %424 = vector.load %arg4[%423, %c0_159] : memref<256x128xf32, #tpu.memory_space<vmem>>, vector<1x128xf32>
      %425 = vector.broadcast %422 : f32 to vector<1x128xf32>
      %426 = arith.mulf %425, %424 : vector<1x128xf32>
      %427 = arith.addf %416, %426 : vector<1x128xf32>
      %c4_i32_160 = arith.constant 4 : i32
      %c7 = arith.constant 7 : index
      %c0_161 = arith.constant 0 : index
      %428 = vector.load %arg7[%c7, %c0_161] : memref<8x128xf32, #tpu.memory_space<vmem>>, vector<1x128xf32>
      tpu.vector_store %arg7[%c7, %c0_161], %427 {strides = array<i32>} : memref<8x128xf32, #tpu.memory_space<vmem>>, vector<1x128xf32>,
    } else {
    }
    %c0 = arith.constant 0 : index
    %c0_1 = arith.constant 0 : index
    %3 = vector.load %arg7[%c0, %c0_1] : memref<8x128xf32, #tpu.memory_space<vmem>>, vector<8x128xf32>
    %c0_2 = arith.constant 0 : index
    %c0_3 = arith.constant 0 : index
    %4 = vector.load %arg5[%c0_2, %c0_3] : memref<128x128xf32, #tpu.memory_space<vmem>>, vector<128x128xf32>
    %cst = arith.constant dense<0.000000e+00> : vector<8x128xf32>
    %5 = tpu.matmul %3, %4, %cst {dimension_numbers = #tpu.dot_dimension_numbers<[1], [1], [0], [0], [0, 0, 1, 0], [], []>} : vector<8x128xf32>, vector<128x128xf32>, vector<8x128xf32> -> vector<8x128xf32>
    %c0_4 = arith.constant 0 : index
    %c0_5 = arith.constant 0 : index
    %6 = vector.load %arg8[%c0_4, %c0_5] : memref<8x1xf32, #tpu.memory_space<vmem>>, vector<8x1xf32>
    %cst_6 = arith.constant dense<0xFF800000> : vector<8xf32>
    %7 = vector.multi_reduction <maximumf>, %5, %cst_6 [1] : vector<8x128xf32> to vector<8xf32>
    %8 = vector.shape_cast %7 : vector<8xf32> to vector<8x1xf32>
    %9 = arith.maximumf %6, %8 : vector<8x1xf32>
    %10 = arith.subf %6, %9 : vector<8x1xf32>
    %11 = math.exp %10 : vector<8x1xf32>
    %c0_7 = arith.constant 0 : index
    %c0_8 = arith.constant 0 : index
    %12 = vector.load %arg9[%c0_7, %c0_8] : memref<8x1xf32, #tpu.memory_space<vmem>>, vector<8x1xf32>
    %13 = arith.mulf %11, %12 : vector<8x1xf32>
    %14 = vector.broadcast %9 : vector<8x1xf32> to vector<8x128xf32>
    %15 = arith.subf %5, %14 : vector<8x128xf32>
    %16 = math.exp %15 : vector<8x128xf32>
    %cst_9 = arith.constant dense<0.000000e+00> : vector<8xf32>
    %17 = vector.multi_reduction <add>, %16, %cst_9 [1] : vector<8x128xf32> to vector<8xf32>
    %18 = vector.shape_cast %17 : vector<8xf32> to vector<8x1xf32>
    %19 = arith.addf %13, %18 : vector<8x1xf32>
    %c0_10 = arith.constant 0 : index
    %c0_11 = arith.constant 0 : index
    %20 = vector.load %arg9[%c0_10, %c0_11] : memref<8x1xf32, #tpu.memory_space<vmem>>, vector<8x1xf32>
    tpu.vector_store %arg9[%c0_10, %c0_11], %19 {strides = array<i32>} : memref<8x1xf32, #tpu.memory_space<vmem>>, vector<8x1xf32>,
    %c0_12 = arith.constant 0 : index
    %c0_13 = arith.constant 0 : index
    %21 = vector.load %arg8[%c0_12, %c0_13] : memref<8x1xf32, #tpu.memory_space<vmem>>, vector<8x1xf32>
    tpu.vector_store %arg8[%c0_12, %c0_13], %9 {strides = array<i32>} : memref<8x1xf32, #tpu.memory_space<vmem>>, vector<8x1xf32>,
    %c128_i32 = arith.constant 128 : i32
    %22 = arith.muli %arg1, %c128_i32 : i32
    %23 = tpu.iota {dimensions = array<i32: 1>} : vector<8x128xi32>
    %24 = vector.broadcast %22 : i32 to vector<8x128xi32>
    %25 = arith.addi %24, %23 : vector<8x128xi32>
    %c0_14 = arith.constant 0 : index
    %c0_15 = arith.constant 0 : index
    %26 = vector.load %arg3[%c0_14, %c0_15] : memref<8x1xi32, #tpu.memory_space<vmem>>, vector<8x1xi32>
    %27 = vector.broadcast %26 : vector<8x1xi32> to vector<8x128xi32>
    %28 = arith.cmpi eq, %25, %27 : vector<8x128xi32>
    %c0_16 = arith.constant 0 : index
    %c0_17 = arith.constant 0 : index
    %29 = vector.load %arg10[%c0_16, %c0_17] : memref<8x1xf32, #tpu.memory_space<vmem>>, vector<8x1xf32>
    %cst_18 = arith.constant 0.000000e+00 : f32
    %30 = vector.broadcast %cst_18 : f32 to vector<8x128xf32>
    %31 = arith.select %28, %5, %30 : vector<8x128xi1>, vector<8x128xf32>
    %cst_19 = arith.constant dense<0.000000e+00> : vector<8xf32>
    %32 = vector.multi_reduction <add>, %31, %cst_19 [1] : vector<8x128xf32> to vector<8xf32>
    %33 = vector.shape_cast %32 : vector<8xf32> to vector<8x1xf32>
    %34 = arith.addf %29, %33 : vector<8x1xf32>
    %c0_20 = arith.constant 0 : index
    %c0_21 = arith.constant 0 : index
    %35 = vector.load %arg10[%c0_20, %c0_21] : memref<8x1xf32, #tpu.memory_space<vmem>>, vector<8x1xf32>
    tpu.vector_store %arg10[%c0_20, %c0_21], %34 {strides = array<i32>} : memref<8x1xf32, #tpu.memory_space<vmem>>, vector<8x1xf32>,
    %c1_i32 = arith.constant 1 : i32
    %36 = arith.cmpi eq, %arg1, %c1_i32 : i32
    %37 = arith.extui %36 : i1 to i32
    %c0_i32_22 = arith.constant 0 : i32
    %38 = arith.cmpi ne, %37, %c0_i32_22 : i32
    scf.if %38 {
      %c0_23 = arith.constant 0 : index
      %c0_24 = arith.constant 0 : index
      %39 = vector.load %arg8[%c0_23, %c0_24] : memref<8x1xf32, #tpu.memory_space<vmem>>, vector<8x1xf32>
      %c0_25 = arith.constant 0 : index
      %c0_26 = arith.constant 0 : index
      %40 = vector.load %arg9[%c0_25, %c0_26] : memref<8x1xf32, #tpu.memory_space<vmem>>, vector<8x1xf32>
      %41 = math.log %40 : vector<8x1xf32>
      %42 = arith.addf %39, %41 : vector<8x1xf32>
      %c0_27 = arith.constant 0 : index
      %c0_28 = arith.constant 0 : index
      %43 = vector.load %arg10[%c0_27, %c0_28] : memref<8x1xf32, #tpu.memory_space<vmem>>, vector<8x1xf32>
      %44 = arith.subf %42, %43 : vector<8x1xf32>
      %c0_29 = arith.constant 0 : index
      %c0_30 = arith.constant 0 : index
      %45 = vector.load %arg6[%c0_29, %c0_30] : memref<8x1xf32, #tpu.memory_space<vmem>>, vector<8x1xf32>
      tpu.vector_store %arg6[%c0_29, %c0_30], %44 {strides = array<i32>} : memref<8x1xf32, #tpu.memory_space<vmem>>, vector<8x1xf32>,
    } else {
    }
    return
  }
  func.func @transform_0(%arg0: i32, %arg1: i32, %arg2: memref<8x4xi32, #tpu.memory_space<smem>>) -> (i32, i32) {
    %c0_i32 = arith.constant 0 : i32
    %c0_i32_0 = arith.constant 0 : i32
    return %arg0, %c0_i32 : i32, i32
  }
  func.func @transform_1(%arg0: i32, %arg1: i32, %arg2: memref<8x4xi32, #tpu.memory_space<smem>>) -> (i32, i32) {
    %c0_i32 = arith.constant 0 : i32
    %c0_i32_0 = arith.constant 0 : i32
    %c0_i32_1 = arith.constant 0 : i32
    return %c0_i32, %c0_i32_0 : i32, i32
  }
  func.func @transform_2(%arg0: i32, %arg1: i32, %arg2: memref<8x4xi32, #tpu.memory_space<smem>>) -> (i32, i32) {
    %c0_i32 = arith.constant 0 : i32
    %c0_i32_0 = arith.constant 0 : i32
    return %arg1, %c0_i32 : i32, i32
  }
  func.func @transform_3(%arg0: i32, %arg1: i32, %arg2: memref<8x4xi32, #tpu.memory_space<smem>>) -> (i32, i32) {
    %c0_i32 = arith.constant 0 : i32
    %c0_i32_0 = arith.constant 0 : i32
    return %arg0, %c0_i32 : i32, i32
  }
}

</mosaic_0001>

<bundles_post_ra>
// kernel: tpu_custom_call.1
= control target key start
LH: loop header
LB: loop body
LE: loop exit
PB: predicated region body
PF: predicated region fallthrough
CT: control target
= control target key end

     0   :  { %s1426_s0 = inlined_call_operand.vmem [shape: s32[8,4], index: 0, kind: input, shape index: {}]   ;;  %s1427_s1 = inlined_call_operand.vmem [shape: s32[8,1], index: 1, kind: input, shape index: {}]   ;;  %s1428_s2 = inlined_call_operand.hbm [shape: f32[256,128], index: 2, kind: input, shape index: {}]   ;;  %s1429_s3 = inlined_call_operand.hbm [shape: f32[256,128], index: 3, kind: input, shape index: {}]   ;;  %s1430_s4 = inlined_call_operand.vmem [shape: f32[8,1], index: 4, kind: output, shape index: {}]  }
   0x1   :  { %s9_s17 = sshll.u32 %s1426_s0, 4  ;;  %s10_s17 = int_to_ptr.vmem [resolvable:$true] %s9_s17 }
   0x2   :  { %s1035_s18 = scalar_lea.vmem %s10_s17, 128  ;;  %p1040_p1 = scmp.lt.s32.totalorder %s10_s17, %s10_s17 }
   0x3   :  { %p1036_p0 = scmp.ne.s32.totalorder %s10_s17, %s1035_s18  ;;  %p1041_p2 = scmp.lt.s32.totalorder %s1035_s18, %s1035_s18 }
   0x5   :  { %p1042_p3 = por %p1041_p2, %p1040_p1 }
   0x7   :  { %p1043_p4 = pnand %p1042_p3, %p1036_p0 }
   0x9   :  { %1046 = shalt.err (!%p1043_p4)  }
   0xa   :  { %s1159_s19 = smov [#allocation7]  }
   0xb   :  { %12 = dma.vmem_to_smem %s10_s17, 128, %s1159_s19, [#allocation6] }
   0xc   :  { %1125 = dma.done.wait [#allocation6], 128 }
   0xd   :  { %1126 = vsyncadd [#allocation6], 4294967168 }
   0xe   :  { %14 = sfence }
   0xf   :  { %15 = vsyncpa [#allocation9], 0 }
  0x10   :  { %16 = vsyncpa [#allocation11], 0 }
  0x11   :  { %18 = vsyncpa [#allocation11 + $0x1], 0  ;;  %s1197_s20 = smov 0   ;;  %s1199_s21 = smov 0  }
  0x12   :  { %s1201_s0 = smov 0   ;;  %s1203_s22 = smov 0  }
  0x13   :  { %s1205_s23 = smov 0   ;;  %s1207_s24 = smov 0  }
  0x14 LB: > { %s852_s25 = sadd.s32 4294967295, %s1157_s24   ;;  %p103_p5 = scmp.ne.s32.totalorder %s1141_s21, %s1137_s20  ;;  %s1157_s24 = sphi %s1207_s24, %s24_s24   ;;  %s1153_s23 = sphi %s1205_s23, %s1440_s23   ;;  %s1149_s22 = sphi %s1203_s22, %s1439_s22   ;;  %s1145_s0 = sphi %s1201_s0, %s1438_s0   ;;  %s1141_s21 = sphi %s1199_s21, %s1437_s21   ;;  %s1137_s20 = sphi %s1197_s20, %s1436_s20  }
  0x15   : > { %p1227_p6 = scmp.eq.s32.totalorder %s852_s25, 0  ;;  %p853_p7 = scmp.ge.s32.totalorder %s1157_s24, 1 }
  0x16   : > { %p140_p8 = scmp.lt.s32.totalorder %s1157_s24, 3  ;;  %s1160_s29 = smov [#allocation8]  }
  0x17   : > { %p1235_p9 = por %p1227_p6, %p103_p5  ;;  %s159_s30 = sshll.u32 %s1160_s29, 4  ;;  %s160_s30 = int_to_ptr.vmem [resolvable:$true] %s159_s30 }
  0x18   : > { %p1239_p10 = pnand %p853_p7, %p140_p8  ;;  %s33_s6 = sadd.s32 1, %s1153_s23 }
  0x19   : > { %s1058_s7 = scalar_lea.vmem %s160_s30, 4096  ;;  %p1066_p3 = scmp.lt.s32.totalorder %s160_s30, %s160_s30 }
  0x1a   : > { %p959_p11 = pneg %p1239_p10  ;;  %p1059_p0 = scmp.ne.s32.totalorder %s160_s30, %s1058_s7 }
  0x1b   : > { %p1067_p4 = scmp.lt.s32.totalorder %s1058_s7, %s1058_s7 }
  0x1c   : > { %p1247_p12 = pnand %p959_p11, %p1227_p6 }
  0x1d   : > { %p1068_p5 = por %p1067_p4, %p1066_p3 }
  0x1e   : > { %p1049_p13 = pneg %p1247_p12 }
  0x20   : > { %p1061_p1 = pnand %p1059_p0, %p1049_p13 }
  0x22   : > { %p1062_p2 = pneg %p1061_p1 }
  0x24   : > { %p1069_p7 = pnand %p1068_p5, %p1062_p2 }
  0x26   : > { %1072 = shalt.err (!%p1069_p7)
}
  0x27   : > { %s1161_s8 = smov 128   ;;  %s1162_s9 = smov 8  }
  0x28   : > { %962 = dma.hbm_to_vmem [thread:$0]  (!%p1247_p12), %s1428_s2, 4096, %s160_s30, [#allocation9], %s1161_s8, %s1161_s8, %s1162_s9  }
  0x29   : > { %p34_p8 = scmp.ge.s32.totalorder %s33_s6, 2  ;;  %s90_s12 = sadd.s32 1, %s1145_s0 }
  0x2a   : > { %p97_p11 = scmp.ne.s32.totalorder %s1145_s0, %s1141_s21  ;;  %p98_p13 = scmp.eq.s32.totalorder %s1157_s24, 0 }
  0x2b   : > { %s1442_s6 = smov (%p34_p8, %s33_s6), 0  ;;  %p968_p1 = scmp.lt.s32.totalorder %s1157_s24, 2 }
  0x2c   : > { %p99_p0 = por %p98_p13, %p97_p11  ;;  %s87_s13 = ssub.s32 %s1153_s23, %s1442_s6 }
  0x2d   : > { %s173_s14 = sand.u32 1, %s1145_s0   ;;  %p88_p2 = scmp.eq.s32.totalorder %s87_s13, 0 }
  0x2e   : > { %s857_s15 = sshll.u32 %s173_s14, 7  ;;  %s900_s16 = sshll.u32 %s1153_s23, 11 }
  0x2f   : > { %s1274_s17 = scalar_select %p88_p2, %s1145_s0, %s90_s12  }
  0x30   : > { %s183_s20 = scalar_lea.hbm %s1429_s3, %s900_s16  ;;  %s177_s25 = scalar_lea.vmem [#allocation10], %s857_s15 }
  0x31   : > { %s184_s29 = sshll.u32 %s177_s25, 4  ;;  %p1279_p12 = pnand %p968_p1, %p99_p0  ;;  %s185_s29 = int_to_ptr.vmem [resolvable:$true] %s184_s29 }
  0x32   : > { %s174_s5 = scalar_lea.sflag [#allocation11], %s173_s14  ;;  %s1086_s7 = scalar_lea.vmem %s185_s29, 2048 }
  0x33   : > { %p1075_p3 = pneg %p1279_p12  ;;  %p1087_p4 = scmp.ne.s32.totalorder %s185_s29, %s1086_s7 }
  0x34   : > { %s1163_s10 = smov [#allocation10]  }
  0x35   : > { %p1089_p5 = pnand %p1087_p4, %p1075_p3  ;;  %s1091_s11 = sshll.u32 %s1163_s10, 4  ;;  %s1092_s11 = int_to_ptr.vmem [resolvable:$false] %s1091_s11 }
  0x36   : > { %s1093_s12 = scalar_lea.vmem %s1092_s11, 4096  ;;  %p1094_p8 = scmp.lt.s32.totalorder %s185_s29, %s1092_s11 }
  0x37   : > { %p1090_p7 = pneg %p1089_p5  ;;  %p1095_p11 = scmp.lt.s32.totalorder %s1093_s12, %s1086_s7 }
  0x39   : > { %p1096_p13 = por %p1095_p11, %p1094_p8 }
  0x3b   : > { %p1097_p0 = pnand %p1096_p13, %p1090_p7 }
  0x3d   : > { %1100 = shalt.err (!%p1097_p0)
}
  0x3e   : > { %966 = dma.hbm_to_vmem [thread:$0]  (!%p1279_p12), %s183_s20, 2048, %s185_s29, %s174_s5, %s1161_s8, %s1161_s8, %s1162_s9  }
  0x3f   : > { %196 = sbr.rel (%p1239_p10) target bundleno = 898 (0x382), region = 32 }
  0x44   : > { %1128 = dma.done.wait (%p1227_p6), [#allocation9], 4096  }
  0x45   : > { %1130 = vsyncadd (%p1227_p6), [#allocation9], 4294963200  ;;  %s202_s13 = sand.u32 1, %s1141_s21  }
  0x46   : > { %s862_s14 = sshll.u32 %s202_s13, 7  ;;  %s203_s15 = scalar_lea.sflag [#allocation11], %s202_s13 }
  0x47   : > { %s1297_s16 = scalar_lea.vmem [#allocation10], %s862_s14 }
  0x48   : > { %1132 = dma.done.wait (%p1235_p9), %s203_s15, 2048  }
  0x49   : > { %1134 = vsyncadd (%p1235_p9), %s203_s15, 4294965248  ;;  %p863_p10 = scmp.ne.s32.totalorder %s1149_s22, 0 }
  0x4a   : > { %s251_s28 = sld [smem:[#allocation7]] (!%p863_p10) }
  0x4b   : > { %244 = sbr.rel (%p863_p10) target bundleno = 189 (0xbd), region = 44  ;;  %s864_s26 = sld [smem:[#allocation7 + $0x1]] (!%p863_p10) }
  0x4c   : > { %s865_s8 = sld [smem:[#allocation7 + $0x2]] (!%p863_p10) }
  0x4d   : > { %s1304_s9 = sld [smem:[#allocation7 + $0x3]] (!%p863_p10) }
  0x4e   : > { %s1306_s18 = sld [smem:[#allocation7 + $0x80]] (!%p863_p10) }
  0x4f   : > { %s1308_s19 = sld [smem:[#allocation7 + $0x81]] (!%p863_p10) }
  0x50   : > { %vm245_vm0 = vcmask 7168   ;;  %v1164_v0 = vmov -inf   ;;  %v1165_v1 = vmov 0.0   ;;  %p252_p6 = scmp.ne.s32.totalorder %s251_s28, 0  ;;  %s255_s29 = scalar_lea.vmem [#allocation8], %s251_s28 }
  0x51   : > { %246 = vst.msk [vmem:[#allocation3] sm:$0xff] %vm245_vm0, %v1164_v0  ;;  %247 = vst.msk [vmem:[#allocation4] sm:$0xff] %vm245_vm0, %v1165_v1  ;;  %p262_p9 = scmp.ne.s32.totalorder %s864_s26, 0  ;;  %v256_v2 = vld [vmem:[%s255_s29] sm:$0x1]  ;;  %s265_s5 = scalar_lea.vmem [#allocation8], %s864_s26 }
  0x52   : > { %248 = vst.msk [vmem:[#allocation5] sm:$0xff] %vm245_vm0, %v1165_v1  ;;  %s253_s27 = scalar_select %p252_p6, 1, 0  ;;  %v266_v3 = vld [vmem:[%s265_s5] sm:$0x1] }
  0x53   : > { %s263_s20 = scalar_select %p262_p9, 1, 0 }
  0x54   : > { %s254_s25 = scvt.s32.f32 %s253_s27  ;;  %p272_p1 = scmp.ne.s32.totalorder %s865_s8, 0 }
  0x55   : > { %s264_s30 = scvt.s32.f32 %s263_s20  ;;  %p282_p2 = scmp.ne.s32.totalorder %s1304_s9, 0 }
  0x56   : > { %v257_v4 = vstv %s254_s25  ;;  %s273_s7 = scalar_select %p272_p1, 1, 0 }
  0x57   : > { %v258_v5 = vmul.f32 %v257_v4, %v256_v2  ;;  %v267_v6 = vstv %s264_s30  ;;  %s275_s11 = scalar_lea.vmem [#allocation8], %s865_s8  ;;  %p294_p12 = scmp.ne.s32.totalorder %s1306_s18, 0 }
  0x58   : > { %v268_v7 = vmul.f32 %v267_v6, %v266_v3  ;;  %s274_s10 = scvt.s32.f32 %s273_s7  ;;  %v276_v8 = vld [vmem:[%s275_s11] sm:$0x1]  ;;  %s285_s15 = scalar_lea.vmem [#allocation8], %s1304_s9 }
  0x59   : > { %s283_s12 = scalar_select %p282_p2, 1, 0  ;;  %v286_v12 = vld [vmem:[%s285_s15] sm:$0x1] }
  0x5a   : > { %v269_v9 = vadd.f32 %v268_v7, %v258_v5  ;;  %v277_v10 = vstv %s274_s10  ;;  %s295_s13 = scalar_select %p294_p12, 1, 0 }
  0x5b   : > { %v278_v11 = vmul.f32 %v277_v10, %v276_v8  ;;  %s284_s14 = scvt.s32.f32 %s283_s12  ;;  %p304_p3 = scmp.ne.s32.totalorder %s1308_s19, 0 }
  0x5c   : > { %s296_s28 = scvt.s32.f32 %s295_s13  ;;  %s869_s26 = sld [smem:[#allocation7 + $0x82]] }
  0x5d   : > { %v279_v13 = vadd.f32 %v278_v11, %v269_v9  ;;  %v287_v14 = vstv %s284_s14  ;;  %s305_s27 = scalar_select %p304_p3, 1, 0 }
  0x5e   : > { %v288_v15 = vmul.f32 %v287_v14, %v286_v12  ;;  %s1314_s8 = sld [smem:[#allocation7 + $0x83]]  ;;  %s297_s29 = scalar_lea.vmem [#allocation8], %s1306_s18  ;;  %v299_v18 = vstv %s296_s28 }
  0x5f   : > { %s306_s20 = scvt.s32.f32 %s305_s27  ;;  %s1316_s25 = sld [smem:[#allocation7 + $0x100]]  ;;  %v298_v17 = vld [vmem:[%s297_s29] sm:$0x1] }
  0x60   : > { %v289_v16 = vadd.f32 %v288_v15, %v279_v13  ;;  %s307_s9 = scalar_lea.vmem [#allocation8], %s1308_s19  ;;  %s1320_s30 = sld [smem:[#allocation7 + $0x101]]  ;;  %v300_v21 = vmul.f32 %v299_v18, %v298_v17 }
  0x61   : > { %v308_v19 = vld [vmem:[%s307_s9] sm:$0x1]  ;;  %v309_v20 = vstv %s306_s20  ;;  %s1322_s5 = sld [smem:[#allocation7 + $0x102]] }
  0x62   : > { %290 = vst [vmem:[#allocation2] sm:$0x1] %v289_v16  ;;  %p314_p4 = scmp.ne.s32.totalorder %s869_s26, 0  ;;  %v310_v22 = vmul.f32 %v309_v20, %v308_v19  ;;  %s1324_s7 = sld [smem:[#allocation7 + $0x103]] }
  0x63   : > { %s317_s11 = scalar_lea.vmem [#allocation8], %s869_s26 }
  0x64   : > { %s315_s10 = scalar_select %p314_p4, 1, 0  ;;  %v318_v23 = vld [vmem:[%s317_s11] sm:$0x1]  ;;  %v311_v24 = vadd.f32 %v310_v22, %v300_v21 }
  0x65   : > { %p324_p5 = scmp.ne.s32.totalorder %s1314_s8, 0  ;;  %p336_p7 = scmp.ne.s32.totalorder %s1316_s25, 0 }
  0x66   : > { %s316_s18 = scvt.s32.f32 %s315_s10  ;;  %s327_s14 = scalar_lea.vmem [#allocation8], %s1314_s8 }
  0x67   : > { %s325_s19 = scalar_select %p324_p5, 1, 0  ;;  %v328_v27 = vld [vmem:[%s327_s14] sm:$0x1] }
  0x68   : > { %v319_v25 = vstv %s316_s18  ;;  %s337_s12 = scalar_select %p336_p7, 1, 0 }
  0x69   : > { %v320_v26 = vmul.f32 %v319_v25, %v318_v23  ;;  %s326_s13 = scvt.s32.f32 %s325_s19  ;;  %p346_p8 = scmp.ne.s32.totalorder %s1320_s30, 0 }
  0x6a   : > { %s338_s15 = scvt.s32.f32 %s337_s12  ;;  %p356_p11 = scmp.ne.s32.totalorder %s1322_s5, 0 }
  0x6b   : > { %v321_v28 = vadd.f32 %v320_v26, %v311_v24  ;;  %v329_v29 = vstv %s326_s13  ;;  %s339_s28 = scalar_lea.vmem [#allocation8], %s1316_s25  ;;  %s349_s29 = scalar_lea.vmem [#allocation8], %s1320_s30 }
  0x6c   : > { %v330_v30 = vmul.f32 %v329_v29, %v328_v27  ;;  %v340_v31 = vld [vmem:[%s339_s28] sm:$0x1]  ;;  %v341_v32 = vstv %s338_s15  ;;  %s347_s26 = scalar_select %p346_p8, 1, 0 }
  0x6d   : > { %s357_s27 = scalar_select %p356_p11, 1, 0  ;;  %v350_v34 = vld [vmem:[%s349_s29] sm:$0x1]  ;;  %v342_v35 = vmul.f32 %v341_v32, %v340_v31 }
  0x6e   : > { %v331_v33 = vadd.f32 %v330_v30, %v321_v28  ;;  %s348_s20 = scvt.s32.f32 %s347_s26  ;;  %s359_s9 = scalar_lea.vmem [#allocation8], %s1322_s5 }
  0x6f   : > { %s358_s8 = scvt.s32.f32 %s357_s27  ;;  %v360_v36 = vld [vmem:[%s359_s9] sm:$0x1]  ;;  %p366_p13 = scmp.ne.s32.totalorder %s1324_s7, 0 }
  0x70   : > { %332 = vst [vmem:[#allocation2 + $0x1] sm:$0x1] %v331_v33  ;;  %v351_v37 = vstv %s348_s20  ;;  %s875_s10 = sld [smem:[#allocation7 + $0x180]]  ;;  %s369_s19 = scalar_lea.vmem [#allocation8], %s1324_s7 }
  0x71   : > { %v352_v38 = vmul.f32 %v351_v37, %v350_v34  ;;  %v361_v39 = vstv %s358_s8  ;;  %s367_s25 = scalar_select %p366_p13, 1, 0  ;;  %v370_v42 = vld [vmem:[%s369_s19] sm:$0x1] }
  0x72   : > { %v362_v40 = vmul.f32 %v361_v39, %v360_v36  ;;  %s876_s18 = sld [smem:[#allocation7 + $0x181]] }
  0x73   : > { %v353_v41 = vadd.f32 %v352_v38, %v342_v35  ;;  %s368_s11 = scvt.s32.f32 %s367_s25  ;;  %s877_s30 = sld [smem:[#allocation7 + $0x182]] }
  0x74   : > { %s1336_s12 = sld [smem:[#allocation7 + $0x183]] }
  0x75   : > { %v363_v43 = vadd.f32 %v362_v40, %v353_v41  ;;  %v371_v44 = vstv %s368_s11  ;;  %s1338_s5 = sld [smem:[#allocation7 + $0x200]] }
  0x76   : > { %v372_v45 = vmul.f32 %v371_v44, %v370_v42  ;;  %p378_p0 = scmp.ne.s32.totalorder %s875_s10, 0  ;;  %s1340_s13 = sld [smem:[#allocation7 + $0x201]] }
  0x77   : > { %s381_s7 = scalar_lea.vmem [#allocation8], %s875_s10  ;;  %s881_s19 = sld [smem:[#allocation7 + $0x202]] }
  0x78   : > { %v373_v46 = vadd.f32 %v372_v45, %v363_v43  ;;  %s379_s14 = scalar_select %p378_p0, 1, 0  ;;  %v382_v47 = vld [vmem:[%s381_s7] sm:$0x1] }
  0x79   : > { %p388_p10 = scmp.ne.s32.totalorder %s876_s18, 0  ;;  %p398_p6 = scmp.ne.s32.totalorder %s877_s30, 0 }
  0x7a   : > { %374 = vst [vmem:[#allocation2 + $0x2] sm:$0x1] %v373_v46  ;;  %s380_s15 = scvt.s32.f32 %s379_s14  ;;  %s391_s20 = scalar_lea.vmem [#allocation8], %s876_s18 }
  0x7b   : > { %s389_s28 = scalar_select %p388_p10, 1, 0  ;;  %v392_v49 = vld [vmem:[%s391_s20] sm:$0x1] }
  0x7c   : > { %v383_v48 = vstv %s380_s15  ;;  %s399_s26 = scalar_select %p398_p6, 1, 0 }
  0x7d   : > { %s390_s27 = scvt.s32.f32 %s389_s28  ;;  %v384_v50 = vmul.f32 %v383_v48, %v382_v47  ;;  %s401_s8 = scalar_lea.vmem [#allocation8], %s877_s30 }
  0x7e   : > { %s400_s29 = scvt.s32.f32 %s399_s26  ;;  %v402_v51 = vld [vmem:[%s401_s8] sm:$0x1]  ;;  %p408_p9 = scmp.ne.s32.totalorder %s1336_s12, 0 }
  0x7f   : > { %v393_v52 = vstv %s390_s27  ;;  %p420_p1 = scmp.ne.s32.totalorder %s1338_s5, 0  ;;  %s411_s11 = scalar_lea.vmem [#allocation8], %s1336_s12 }
  0x80   : > { %v394_v53 = vmul.f32 %v393_v52, %v392_v49  ;;  %v403_v54 = vstv %s400_s29  ;;  %s409_s9 = scalar_select %p408_p9, 1, 0  ;;  %v412_v57 = vld [vmem:[%s411_s11] sm:$0x1] }
  0x81   : > { %v404_v55 = vmul.f32 %v403_v54, %v402_v51  ;;  %s421_s10 = scalar_select %p420_p1, 1, 0 }
  0x82   : > { %v395_v56 = vadd.f32 %v394_v53, %v384_v50  ;;  %s410_s25 = scvt.s32.f32 %s409_s9  ;;  %p430_p2 = scmp.ne.s32.totalorder %s1340_s13, 0 }
  0x83   : > { %s422_s18 = scvt.s32.f32 %s421_s10  ;;  %s1346_s14 = sld [smem:[#allocation7 + $0x203]] }
  0x84   : > { %v405_v58 = vadd.f32 %v404_v55, %v395_v56  ;;  %v413_v59 = vstv %s410_s25  ;;  %s431_s30 = scalar_select %p430_p2, 1, 0 }
  0x85   : > { %v414_v60 = vmul.f32 %v413_v59, %v412_v57  ;;  %s1348_s7 = sld [smem:[#allocation7 + $0x280]]  ;;  %s423_s28 = scalar_lea.vmem [#allocation8], %s1338_s5  ;;  %v425_v63 = vstv %s422_s18 }
  0x86   : > { %s432_s15 = scvt.s32.f32 %s431_s30  ;;  %v424_v62 = vld [vmem:[%s423_s28] sm:$0x1]  ;;  %s433_s12 = scalar_lea.vmem [#allocation8], %s1340_s13 }
  0x87   : > { %v415_v61 = vadd.f32 %v414_v60, %v405_v58  ;;  %v434_v0 = vld [vmem:[%s433_s12] sm:$0x1]  ;;  %s1352_s26 = sld [smem:[#allocation7 + $0x281]]  ;;  %p440_p12 = scmp.ne.s32.totalorder %s881_s19, 0  ;;  %v426_v2 = vmul.f32 %v425_v63, %v424_v62 }
  0x88   : > { %v435_v1 = vstv %s432_s15  ;;  %s1354_s27 = sld [smem:[#allocation7 + $0x282]]  ;;  %s443_s8 = scalar_lea.vmem [#allocation8], %s881_s19 }
  0x89   : > { %416 = vst [vmem:[#allocation2 + $0x3] sm:$0x1] %v415_v61  ;;  %v436_v3 = vmul.f32 %v435_v1, %v434_v0  ;;  %s1356_s20 = sld [smem:[#allocation7 + $0x283]]  ;;  %p450_p3 = scmp.ne.s32.totalorder %s1346_s14, 0  ;;  %v444_v4 = vld [vmem:[%s443_s8] sm:$0x1] }
  0x8a   : > { %s441_s29 = scalar_select %p440_p12, 1, 0 }
  0x8b   : > { %p462_p4 = scmp.ne.s32.totalorder %s1348_s7, 0  ;;  %v437_v5 = vadd.f32 %v436_v3, %v426_v2  ;;  %s453_s25 = scalar_lea.vmem [#allocation8], %s1346_s14 }
  0x8c   : > { %s442_s5 = scvt.s32.f32 %s441_s29  ;;  %v454_v8 = vld [vmem:[%s453_s25] sm:$0x1]  ;;  %s465_s18 = scalar_lea.vmem [#allocation8], %s1348_s7 }
  0x8d   : > { %s451_s13 = scalar_select %p450_p3, 1, 0  ;;  %v466_v12 = vld [vmem:[%s465_s18] sm:$0x1] }
  0x8e   : > { %v445_v6 = vstv %s442_s5  ;;  %s463_s9 = scalar_select %p462_p4, 1, 0 }
  0x8f   : > { %v446_v7 = vmul.f32 %v445_v6, %v444_v4  ;;  %s452_s10 = scvt.s32.f32 %s451_s13  ;;  %p472_p5 = scmp.ne.s32.totalorder %s1352_s26, 0 }
  0x90   : > { %s464_s11 = scvt.s32.f32 %s463_s9  ;;  %p482_p7 = scmp.ne.s32.totalorder %s1354_s27, 0 }
  0x91   : > { %v447_v9 = vadd.f32 %v446_v7, %v437_v5  ;;  %v455_v10 = vstv %s452_s10  ;;  %s473_s19 = scalar_select %p472_p5, 1, 0 }
  0x92   : > { %v456_v11 = vmul.f32 %v455_v10, %v454_v8  ;;  %v467_v13 = vstv %s464_s11  ;;  %s483_s30 = scalar_select %p482_p7, 1, 0 }
  0x93   : > { %s474_s15 = scvt.s32.f32 %s473_s19  ;;  %s475_s28 = scalar_lea.vmem [#allocation8], %s1352_s26  ;;  %v468_v16 = vmul.f32 %v467_v13, %v466_v12 }
  0x94   : > { %v457_v14 = vadd.f32 %v456_v11, %v447_v9  ;;  %v476_v15 = vld [vmem:[%s475_s28] sm:$0x1]  ;;  %s484_s14 = scvt.s32.f32 %s483_s30  ;;  %s485_s12 = scalar_lea.vmem [#allocation8], %s1354_s27 }
  0x95   : > { %v486_v17 = vld [vmem:[%s485_s12] sm:$0x1]  ;;  %p492_p8 = scmp.ne.s32.totalorder %s1356_s20, 0  ;;  %v477_v18 = vstv %s474_s15  ;;  %s887_s29 = sld [smem:[#allocation7 + $0x300]] }
  0x96   : > { %458 = vst [vmem:[#allocation2 + $0x4] sm:$0x1] %v457_v14  ;;  %v478_v19 = vmul.f32 %v477_v18, %v476_v15  ;;  %v487_v20 = vstv %s484_s14  ;;  %s888_s5 = sld [smem:[#allocation7 + $0x301]]  ;;  %s495_s13 = scalar_lea.vmem [#allocation8], %s1356_s20 }
  0x97   : > { %s493_s7 = scalar_select %p492_p8, 1, 0  ;;  %v488_v21 = vmul.f32 %v487_v20, %v486_v17  ;;  %v496_v23 = vld [vmem:[%s495_s13] sm:$0x1] }
  0x98   : > { %v479_v22 = vadd.f32 %v478_v19, %v468_v16  ;;  %s889_s26 = sld [smem:[#allocation7 + $0x302]] }
  0x99   : > { %s494_s8 = scvt.s32.f32 %s493_s7  ;;  %s1368_s9 = sld [smem:[#allocation7 + $0x303]] }
  0x9a   : > { %v489_v24 = vadd.f32 %v488_v21, %v479_v22  ;;  %s1370_s27 = sld [smem:[#allocation7 + $0x380]] }
  0x9b   : > { %v497_v25 = vstv %s494_s8  ;;  %p504_p11 = scmp.ne.s32.totalorder %s887_s29, 0  ;;  %s1372_s10 = sld [smem:[#allocation7 + $0x381]] }
  0x9c   : > { %v498_v26 = vmul.f32 %v497_v25, %v496_v23  ;;  %p514_p13 = scmp.ne.s32.totalorder %s888_s5, 0  ;;  %s507_s20 = scalar_lea.vmem [#allocation8], %s887_s29 }
  0x9d   : > { %s505_s25 = scalar_select %p504_p11, 1, 0  ;;  %v508_v28 = vld [vmem:[%s507_s20] sm:$0x1] }
  0x9e   : > { %v499_v27 = vadd.f32 %v498_v26, %v489_v24  ;;  %p524_p0 = scmp.ne.s32.totalorder %s889_s26, 0  ;;  %s517_s15 = scalar_lea.vmem [#allocation8], %s888_s5 }
  0x9f   : > { %s506_s11 = scvt.s32.f32 %s505_s25  ;;  %v518_v30 = vld [vmem:[%s517_s15] sm:$0x1]  ;;  %s527_s14 = scalar_lea.vmem [#allocation8], %s889_s26 }
  0xa0   : > { %500 = vst [vmem:[#allocation2 + $0x5] sm:$0x1] %v499_v27  ;;  %s515_s18 = scalar_select %p514_p13, 1, 0  ;;  %v528_v32 = vld [vmem:[%s527_s14] sm:$0x1] }
  0xa1   : > { %v509_v29 = vstv %s506_s11  ;;  %s525_s19 = scalar_select %p524_p0, 1, 0 }
  0xa2   : > { %s516_s30 = scvt.s32.f32 %s515_s18  ;;  %v510_v31 = vmul.f32 %v509_v29, %v508_v28  ;;  %p534_p10 = scmp.ne.s32.totalorder %s1368_s9, 0 }
  0xa3   : > { %s526_s28 = scvt.s32.f32 %s525_s19  ;;  %p546_p6 = scmp.ne.s32.totalorder %s1370_s27, 0 }
  0xa4   : > { %v519_v33 = vstv %s516_s30  ;;  %s535_s12 = scalar_select %p534_p10, 1, 0 }
  0xa5   : > { %v520_v34 = vmul.f32 %v519_v33, %v518_v30  ;;  %v529_v35 = vstv %s526_s28  ;;  %s547_s29 = scalar_select %p546_p6, 1, 0 }
  0xa6   : > { %v530_v36 = vmul.f32 %v529_v35, %v528_v32  ;;  %s536_s7 = scvt.s32.f32 %s535_s12  ;;  %s537_s5 = scalar_lea.vmem [#allocation8], %s1368_s9 }
  0xa7   : > { %v521_v37 = vadd.f32 %v520_v34, %v510_v31  ;;  %v538_v38 = vld [vmem:[%s537_s5] sm:$0x1]  ;;  %s548_s8 = scvt.s32.f32 %s547_s29  ;;  %p556_p9 = scmp.ne.s32.totalorder %s1372_s10, 0 }
  0xa8   : > { %v539_v40 = vstv %s536_s7  ;;  %s893_s13 = sld [smem:[#allocation7 + $0x382]]  ;;  %s549_s20 = scalar_lea.vmem [#allocation8], %s1370_s27 }
  0xa9   : > { %v531_v39 = vadd.f32 %v530_v36, %v521_v37  ;;  %v540_v41 = vmul.f32 %v539_v40, %v538_v38  ;;  %s557_s26 = scalar_select %p556_p9, 1, 0  ;;  %v550_v43 = vld [vmem:[%s549_s20] sm:$0x1]  ;;  %v551_v44 = vstv %s548_s8 }
  0xaa   : > { %s894_s25 = sld [smem:[#allocation7 + $0x383]]  ;;  %s559_s18 = scalar_lea.vmem [#allocation8], %s1372_s10  ;;  %v552_v47 = vmul.f32 %v551_v44, %v550_v43 }
  0xab   : > { %v541_v42 = vadd.f32 %v540_v41, %v531_v39  ;;  %s558_s11 = scvt.s32.f32 %s557_s26  ;;  %v560_v45 = vld [vmem:[%s559_s18] sm:$0x1] }
  0xad   : > { %542 = vst [vmem:[#allocation2 + $0x6] sm:$0x1] %v541_v42  ;;  %v561_v46 = vstv %s558_s11 }
  0xae   : > { %p566_p1 = scmp.ne.s32.totalorder %s893_s13, 0  ;;  %v562_v48 = vmul.f32 %v561_v46, %v560_v45  ;;  %s569_s30 = scalar_lea.vmem [#allocation8], %s893_s13 }
  0xaf   : > { %v570_v49 = vld [vmem:[%s569_s30] sm:$0x1] }
  0xb0   : > { %s567_s9 = scalar_select %p566_p1, 1, 0  ;;  %v563_v50 = vadd.f32 %v562_v48, %v552_v47 }
  0xb1   : > { %p576_p2 = scmp.ne.s32.totalorder %s894_s25, 0  ;;  %s579_s27 = scalar_lea.vmem [#allocation8], %s894_s25 }
  0xb2   : > { %s568_s19 = scvt.s32.f32 %s567_s9  ;;  %v580_v53 = vld [vmem:[%s579_s27] sm:$0x1] }
  0xb3   : > { %s577_s15 = scalar_select %p576_p2, 1, 0 }
  0xb4   : > { %v571_v51 = vstv %s568_s19 }
  0xb5   : > { %v572_v52 = vmul.f32 %v571_v51, %v570_v49  ;;  %s578_s28 = scvt.s32.f32 %s577_s15 }
  0xb7   : > { %v573_v54 = vadd.f32 %v572_v52, %v563_v50  ;;  %v581_v55 = vstv %s578_s28 }
  0xb8   : > { %v582_v56 = vmul.f32 %v581_v55, %v580_v53 }
  0xba   : > { %v583_v57 = vadd.f32 %v582_v56, %v573_v54 }
  0xbc   : > { %584 = vst [vmem:[#allocation2 + $0x7] sm:$0x1] %v583_v57 }
  0xbd PF: > { %v601_v58 = vld [vmem:[%s1297_s16 + $0x78] sm:$0xff]  ;;  %v1166_v59 = vmov 0.0   ;;  %vm1167_vm1 = vmmov 0   ;;  %v1168_v60 = vmov 0   ;;  %v600_v61 = vld [vmem:[%s1297_s16 + $0x70] sm:$0xff]  ;;  %v700_v62 = vld [vmem:[%s1427_s1] sm:$0xff]  ;;  %v696_v23 = vlaneseq }
  0xbe   : > { %918 = vmatprep.subr.mxu0 %v1166_v59  ;;  %950 = vmatprep.mubr.msk.f32.mxu0 %vm1167_vm1, %v1166_v59  ;;  %v599_v63 = vld [vmem:[%s1297_s16 + $0x68] sm:$0xff]  ;;  %v598_v0 = vld [vmem:[%s1297_s16 + $0x60] sm:$0xff]  ;;  %v597_v1 = vld [vmem:[%s1297_s16 + $0x58] sm:$0xff]  ;;  %vm692_vm2 = vcmask 7168   ;;  %p896_p12 = scmp.ne.s32.totalorder %s1149_s22, 1 }
  0xbf   : > { %919 = vmatpush3.xpose.msra.mxu0 %v601_v58  ;;  %1028 = vset.pattern.permute.xlu1 %v1168_v60  ;;  %v596_v2 = vld [vmem:[%s1297_s16 + $0x50] sm:$0xff]  ;;  %v595_v3 = vld [vmem:[%s1297_s16 + $0x48] sm:$0xff]  ;;  %v594_v4 = vld [vmem:[%s1297_s16 + $0x40] sm:$0xff]  ;;  %v697_v24 = vand.u32 127, %v696_v23 }
  0xc0   : > { %920 = vmatprep.subr.mxu0 %v1166_v59  ;;  %1027 = vset.pattern.permute.xlu0 %v1168_v60  ;;  %v593_v5 = vld [vmem:[%s1297_s16 + $0x38] sm:$0xff]  ;;  %v592_v6 = vld [vmem:[%s1297_s16 + $0x30] sm:$0xff]  ;;  %v591_v7 = vld [vmem:[%s1297_s16 + $0x28] sm:$0xff] }
  0xc1   : > { %702 = vperm.xlu1 %1028, %v700_v62   ;;  %v590_v8 = vld [vmem:[%s1297_s16 + $0x20] sm:$0xff]  ;;  %v589_v9 = vld [vmem:[%s1297_s16 + $0x18] sm:$0xff]  ;;  %v588_v10 = vld [vmem:[%s1297_s16 + $0x10] sm:$0xff] }
  0xc2   : > { %v587_v11 = vld [vmem:[%s1297_s16 + $0x8] sm:$0xff]  ;;  %v586_v12 = vld [vmem:[%s1297_s16] sm:$0xff]  ;;  %s895_s16 = sshll.u32 %s1149_s22, 7  ;;  %v679_v32 = vld [vmem:[#allocation4] sm:$0xff] }
  0xc3   : > { %921 = vmatpush3.xpose.msra.mxu0 %v600_v61  ;;  %v585_v13 = vld [vmem:[#allocation2] sm:$0xff]  ;;  %v672_v16 = vld [vmem:[#allocation3] sm:$0xff]  ;;  %v698_v25 = vstv %s895_s16  ;;  %v705_v36 = vld [vmem:[#allocation5] sm:$0xff] }
  0xc4   : > { %922 = vmatprep.subr.mxu0 %v1166_v59  ;;  %v699_v26 = vadd.s32 %v698_v25, %v697_v24 }
  0xc7   : > { %923 = vmatpush3.xpose.msra.mxu0 %v599_v63 }
  0xc8   : > { %924 = vmatprep.subr.mxu0 %v1166_v59 }
  0xcb   : > { %925 = vmatpush3.xpose.msra.mxu0 %v598_v0 }
  0xcc   : > { %926 = vmatprep.subr.mxu0 %v1166_v59 }
  0xcf   : > { %927 = vmatpush3.xpose.msra.mxu0 %v597_v1 }
  0xd0   : > { %928 = vmatprep.subr.mxu0 %v1166_v59 }
  0xd3   : > { %929 = vmatpush3.xpose.msra.mxu0 %v596_v2 }
  0xd4   : > { %930 = vmatprep.subr.mxu0 %v1166_v59 }
  0xd7   : > { %931 = vmatpush3.xpose.msra.mxu0 %v595_v3 }
  0xd8   : > { %932 = vmatprep.subr.mxu0 %v1166_v59 }
  0xdb   : > { %933 = vmatpush3.xpose.msra.mxu0 %v594_v4 }
  0xdc   : > { %934 = vmatprep.subr.mxu0 %v1166_v59 }
  0xdf   : > { %935 = vmatpush3.xpose.msra.mxu0 %v593_v5 }
  0xe0   : > { %936 = vmatprep.subr.mxu0 %v1166_v59 }
  0xe3   : > { %937 = vmatpush3.xpose.msra.mxu0 %v592_v6 }
  0xe4   : > { %938 = vmatprep.subr.mxu0 %v1166_v59 }
  0xe7   : > { %939 = vmatpush3.xpose.msra.mxu0 %v591_v7 }
  0xe8   : > { %940 = vmatprep.subr.mxu0 %v1166_v59 }
  0xeb   : > { %941 = vmatpush3.xpose.msra.mxu0 %v590_v8 }
  0xec   : > { %942 = vmatprep.subr.mxu0 %v1166_v59 }
  0xef   : > { %943 = vmatpush3.xpose.msra.mxu0 %v589_v9 }
  0xf0   : > { %944 = vmatprep.subr.mxu0 %v1166_v59 }
  0xf3   : > { %945 = vmatpush3.xpose.msra.mxu0 %v588_v10 }
  0xf4   : > { %946 = vmatprep.subr.mxu0 %v1166_v59 }
  0xf7   : > { %947 = vmatpush3.xpose.msra.mxu0 %v587_v11 }
  0xf8   : > { %948 = vmatprep.subr.mxu0 %v1166_v59 }
  0xfb   : > { %949 = vmatpush3.xpose.msra.mxu0 %v586_v12 }
  0xfe   : > { %951 = vmatmul.mubr.f32.vlgmr.msra.gmra.mxu0 %v585_v13 }
 0x13c   : > { %v703_v27 = vpop.permute.xlu1 %702 }
 0x13d   : > { %vm704_vm3 = vcmp.eq.s32.totalorder %v699_v26, %v703_v27 }
 0x1be   : > { %v668_v14 = vpop.f32.mrf.mxu0 }
 0x1bf   : > { %673 = vmax.xlane.f32.xlu0 %v668_v14  ;;  %v706_v29 = vsel %vm704_vm3, %v668_v14, 0.0 }
 0x1c0   : > { %v952_v15 = vpop.f32.mrf.mxu0 }
 0x248   : > { %v674_v17 = vpop.xlane.xlu0 %673 }
 0x249   : > { %v675_v18 = vmax.f32 %v672_v16, %v674_v17 }
 0x24b   : > { %v676_v19 = vsub.f32 %v672_v16, %v675_v18  ;;  %694 = vst.msk [vmem:[#allocation3] sm:$0xff] %vm692_vm2, %v675_v18  ;;  %683 = vperm.xlu0 %1027, %v675_v18  }
 0x24d   : > { %v677_v30 = vmul.f32 1.442695, %v676_v19 }
 0x2c6   : > { %v684_v20 = vpop.permute.xlu0 %683 }
 0x2c7   : > { %v686_v21 = vsub.f32 %v668_v14, %v684_v20 }
 0x2c9   : > { %v687_v22 = vmul.f32 1.442695, %v686_v21 }
 0x2cb   : > { %1029 = vpow2.f32 %v687_v22 }
 0x2cc   : > { %1031 = vpow2.f32 %v677_v30 }
 0x2d8   : > { %v1030_v28 = vpop.eup %1029 }
 0x2d9   : > { %689 = vadd.xlane.f32.xlu1 %v1030_v28  ;;  %v1032_v31 = vpop.eup %1031 }
 0x2da   : > { %v680_v33 = vmul.f32 %v1032_v31, %v679_v32 }
 0x2dd   : > { %707 = vadd.xlane.f32.xlu1 %v706_v29 }
 0x362   : > { %v690_v34 = vpop.xlane.xlu1 %689 }
 0x363   : > { %v691_v35 = vadd.f32 %v690_v34, %v680_v33 }
 0x365   : > { %693 = vst.msk [vmem:[#allocation4] sm:$0xff] %vm692_vm2, %v691_v35  ;;  %714 = sbr.rel (%p896_p12) target bundleno = 898 (0x382), region = 48 }
 0x366   : > { %v708_v37 = vpop.xlane.xlu1 %707 }
 0x367   : > { %v709_v38 = vadd.f32 %v708_v37, %v705_v36 }
 0x369   : > { %710 = vst.msk [vmem:[#allocation5] sm:$0xff] %vm692_vm2, %v709_v38 }
 0x36a   : > { %v715_v41 = vld [vmem:[#allocation3] sm:$0xff] }
 0x36c   : > { %v716_v39 = vld [vmem:[#allocation4] sm:$0xff] }
 0x36d   : > { %1033 = vlog2.f32 %v716_v39 }
 0x370   : > { %v720_v43 = vld [vmem:[#allocation5] sm:$0xff] }
 0x37a   : > { %v1034_v40 = vpop.eup %1033 }
 0x37b   : > { %v718_v42 = vmul.f32 0.6931472, %v1034_v40 }
 0x37d   : > { %v719_v44 = vadd.f32 %v718_v42, %v715_v41 }
 0x37f   : > { %v721_v45 = vsub.f32 %v719_v44, %v720_v43 }
 0x381   : > { %722 = vst.msk [vmem:[%s1430_s4] sm:$0xff] %vm692_vm2, %v721_v45 }
 0x382 PF: > { %s24_s24 = sadd.s32 1, %s1157_s24   ;;  %s1436_s20 = smov %s1141_s21 }
 0x383   : > { %p21_p3 = scmp.ge.s32.totalorder %s24_s24, 4   ;;  %s1437_s21 = smov %s1145_s0 }
 0x384   : > { %s1438_s0 = smov %s1274_s17  ;;  %s1439_s22 = smov %s1153_s23 }
 0x385   : > { %s1440_s23 = smov %s1442_s6  ;;  %23 = sbr.rel (!%p21_p3) target bundleno = 20 (0x14), region = 120 }
 0x38a   :  { %742 = vsyncpa [#allocation9], 1 }
 0x38b   :  { %744 = vsyncpa [#allocation9 + $0x1], 1 }
 0x38c   :  { %745 = vsyncpa [#allocation11], 1 }
 0x38d   :  { %747 = vsyncpa [#allocation11 + $0x1], 1 }

</bundles_post_ra>
